<compile_context>
chip_gen: v7x
topology: tpu7x:2x2x1
jax: 0.10.0
libtpu: 0.0.40
codegen_flags: <defaults>
</compile_context>

<pallas_src>
import functools

import jax
import jax.numpy as jnp
from jax.experimental import pallas as pl
from jax.experimental.pallas import tpu as pltpu

K = 5                    # synthetic kernel size (filters.mat is not available)
PAD = (K - 1) // 2       # same formula as the PyTorch module
HALO = 4 * PAD           # extra x rows needed below a tile (2*PAD for y halo + its conv)


def _precise_recip(d):
    """1/d: EUP approximate seed + two Newton steps (~f32-exact, ~6 VALU + 1 EUP ops)."""
    r = pl.reciprocal(d, approx=True)
    r = r * (2.0 - d * r)
    r = r * (2.0 - d * r)
    return r


def _retinal_dn_kernel(xa_ref, xb_ref, wp_ref, out_ref, pad_ref, *, r_last):
    """One (batch, row-tile) step of the fused RetinalDN forward.

    xa_ref : (1, TH, W)    body rows of the vertically edge-pre-padded input
    xb_ref : (1, HALO, W)  the next HALO rows of the pre-padded input (bottom halo)
    wp_ref : (3*K*K + 2,)  SMEM packed [w_lin | w_lum | w_con | p0, p1]
    out_ref: (1, TH, W)
    pad_ref: (TH + HALO, W + 2*PAD) VMEM scratch (padded x, then reused for padded y**2)
    r_last : static number of valid output rows in the last row tile.
    """
    TH, W = out_ref.shape[1], out_ref.shape[2]
    XEXT = TH + HALO            # x rows this tile needs
    YEXT = TH + 2 * PAD         # y rows this tile computes (body + stage-2 halo)
    Wp = W + 2 * PAD

    t = pl.program_id(1)
    last_t = pl.num_programs(1) - 1

    # ---- replicate-padded x tile in VMEM scratch (lane padding only; vertical
    # ---- replicate padding already lives in the pre-padded input rows) ----------
    pad_ref[0:TH, PAD:PAD + W] = xa_ref[0]
    pad_ref[TH:XEXT, PAD:PAD + W] = xb_ref[0]
    pad_ref[:, 0:PAD] = jnp.broadcast_to(pad_ref[:, PAD:PAD + 1], (XEXT, PAD))
    pad_ref[:, PAD + W:Wp] = jnp.broadcast_to(pad_ref[:, PAD + W - 1:PAD + W], (XEXT, PAD))

    # ---- stage 1: lin/lum 5x5 convs + divisive normalization -> y (YEXT rows) ----
    acc_lin = jnp.zeros((YEXT, W), jnp.float32)
    acc_lum = jnp.zeros((YEXT, W), jnp.float32)
    for dj in range(K):                       # taps read ref slices (vld/XLU slots),
        for di in range(K):                   # one load shared by both filters
            patch = pad_ref[di:di + YEXT, dj:dj + W]
            acc_lin = acc_lin + wp_ref[0 * K * K + di * K + dj] * patch
            acc_lum = acc_lum + wp_ref[1 * K * K + di * K + dj] * patch
    p0 = wp_ref[3 * K * K + 0]
    y = acc_lin * _precise_recip(1.0 + p0 * acc_lum)            # (YEXT, W)

    # ---- stage 2: replicate-padded y**2 written back into the same scratch -------
    y2 = y * y
    pad_ref[0:YEXT, PAD:PAD + W] = y2

    @pl.when(t == 0)                # true image top: pad rows replicate y[0]**2
    def _():
        pad_ref[0:PAD, PAD:PAD + W] = jnp.broadcast_to(y2[PAD:PAD + 1, :], (PAD, W))

    @pl.when(t == last_t)           # true image bottom: replicate y[H-1]**2
    def _():
        nrep = YEXT - (r_last + PAD)
        pad_ref[r_last + PAD:YEXT, PAD:PAD + W] = jnp.broadcast_to(
            y2[r_last + PAD - 1:r_last + PAD, :], (nrep, W))

    pad_ref[0:YEXT, 0:PAD] = jnp.broadcast_to(pad_ref[0:YEXT, PAD:PAD + 1], (YEXT, PAD))
    pad_ref[0:YEXT, PAD + W:Wp] = jnp.broadcast_to(
        pad_ref[0:YEXT, PAD + W - 1:PAD + W], (YEXT, PAD))

    # contrast conv + second divisive normalization + softplus
    acc_con = jnp.zeros((TH, W), jnp.float32)
    for dj in range(K):
        for di in range(K):
            acc_con = acc_con + wp_ref[2 * K * K + di * K + dj] * pad_ref[di:di + TH, dj:dj + W]
    c = jnp.sqrt(acc_con + 1e-6)
    p1 = wp_ref[3 * K * K + 1]
    z = y[PAD:PAD + TH, :] * _precise_recip(1.0 + p1 * c)
    # nn.Softplus (beta=1, threshold=20); clamp so the untaken branch never hits inf.
    out_ref[0] = jnp.where(z > 20.0, z, jnp.log1p(jnp.exp(jnp.minimum(z, 20.0))))


def _round_up(v, m):
    return (v + m - 1) // m * m


def _choose_tile_h(H, W):
    # ~48 B of VMEM per tile pixel (double-buffered in/out blocks, padded scratch and
    # ~4 full-tile f32 compiler temps).  A ~12 MiB budget stays inside every
    # generation's default scoped-VMEM limit and far below v7x's 64 MiB physical VMEM.
    budget = 12 * 1024 * 1024
    th = budget // (48 * max(W, 1))
    th = max(8, min(512, (th // 8) * 8))
    return min(th, _round_up(H, 8))


def retinal_dn(x, w_lin, w_lum, w_con, params, *, tile_h=None):
    """x: (B, H, W) f32; w_*: (K, K) f32; params: (2,) f32 -> (B, H, W) f32."""
    x = x.astype(jnp.float32)
    B, H, W = x.shape

    TH = _choose_tile_h(H, W) if tile_h is None else max(8, (int(tile_h) // 8) * 8)
    TH = min(TH, _round_up(H, 8))          # multiple of 8 (TPU sublane tiling rule)
    NT = -(-H // TH)                        # number of row tiles
    R = TH // HALO                          # halo-block stride (TH % 8 == 0)
    r_last = H - (NT - 1) * TH              # valid output rows in the last tile

    # Vertical replicate padding is done once here (one cheap XLA edge-pad pass) so
    # every x row the kernel needs is a plain in-bounds block and the input pipeline
    # stays fully automatic.  Lane padding and the stage-2 y**2 padding are in-kernel.
    pad_bot = NT * TH + 2 * PAD - H
    x_v = jnp.pad(x, ((0, 0), (2 * PAD, pad_bot), (0, 0)), mode="edge")

    # Pack filters + params into one flat SMEM array: [lin(25) | lum(25) | con(25) | p0, p1]
    packed = jnp.concatenate(
        [w_lin.reshape(-1), w_lum.reshape(-1), w_con.reshape(-1),
         params.reshape(-1)]).astype(jnp.float32)

    est = 48 * TH * W + (TH + HALO) * (W + 2 * PAD) * 4
    vmem_limit = int(min(64 * 1024 * 1024, max(32 * 1024 * 1024, 2 * est)))

    out_v = pl.pallas_call(
        functools.partial(_retinal_dn_kernel, r_last=r_last),
        out_shape=jax.ShapeDtypeStruct((B, NT * TH, W), jnp.float32),
        grid=(B, NT),
        in_specs=[
            pl.BlockSpec((1, TH, W), lambda b, t: (b, t, 0)),               # body rows
            pl.BlockSpec((1, HALO, W), lambda b, t: (b, (t + 1) * R, 0)),   # bottom halo
            pl.BlockSpec(memory_space=pltpu.MemorySpace.SMEM),              # packed weights
        ],
        out_specs=pl.BlockSpec((1, TH, W), lambda b, t: (b, t, 0)),
        scratch_shapes=[pltpu.VMEM((TH + HALO, W + 2 * PAD), jnp.float32)],
        compiler_params=pltpu.CompilerParams(
            dimension_semantics=("parallel", "parallel"),
            vmem_limit_bytes=vmem_limit),
    )(x_v, x_v, packed)
    return out_v[:, :H, :]


if __name__ == "__main__":
    # TODO(synk): the original module loads filters.mat / params.mat; the three
    # 1x1xKxK filters and the 2 params are synthesized deterministically instead.
    key = jax.random.PRNGKey(0)
    kx1, kx2 = jax.random.split(key)

    coords = jnp.arange(K, dtype=jnp.float32) - PAD
    yy, xx = jnp.meshgrid(coords, coords, indexing="ij")

    def gauss(sigma):
        g = jnp.exp(-(xx ** 2 + yy ** 2) / (2.0 * sigma * sigma))
        return g / jnp.sum(g)

    w_lin = (gauss(0.8) - 0.5 * gauss(1.6)).astype(jnp.float32)   # DoG "linear" RF
    w_lum = gauss(1.2).astype(jnp.float32)                        # luminance pool
    w_con = gauss(1.0).astype(jnp.float32)                        # contrast pool
    params = jnp.array([0.5, 2.0], dtype=jnp.float32)             # p0, p1

    def reference(x):
        def rpad(a):
            return jnp.pad(a, ((0, 0), (PAD, PAD), (PAD, PAD)), mode="edge")

        def conv(a, w):
            Ho, Wo = a.shape[1] - 2 * PAD, a.shape[2] - 2 * PAD
            out = jnp.zeros((a.shape[0], Ho, Wo), jnp.float32)
            for di in range(K):
                for dj in range(K):
                    out = out + w[di, dj] * a[:, di:di + Ho, dj:dj + Wo]
            return out

        xp = rpad(x)
        y = conv(xp, w_lin) / (1.0 + params[0] * conv(xp, w_lum))
        c = jnp.sqrt(conv(rpad(y * y), w_con) + 1e-6)
        z = y / (1.0 + params[1] * c)
        return jnp.where(z > 20.0, z, jnp.log1p(jnp.exp(jnp.minimum(z, 20.0))))

    # Shapes implied by the module's forward: (B, H, W), single implicit channel.
    x1 = jax.random.uniform(kx1, (2, 16, 16), dtype=jnp.float32)
    out1 = jax.block_until_ready(retinal_dn(x1, w_lin, w_lum, w_con, params))
    assert out1.shape == x1.shape and out1.dtype == jnp.float32
    assert jnp.allclose(out1, reference(x1), rtol=1e-4, atol=1e-5), "mismatch (single tile)"

    # Multi-tile path with a ragged last row tile (exercises the halo + fix-up logic).
    x2 = jax.random.uniform(kx2, (2, 19, 16), dtype=jnp.float32)
    out2 = jax.block_until_ready(retinal_dn(x2, w_lin, w_lum, w_con, params, tile_h=8))
    assert out2.shape == x2.shape
    assert jnp.allclose(out2, reference(x2), rtol=1e-4, atol=1e-5), "mismatch (row-tiled)"

    print("KERNEL_OK")
</pallas_src>

<mosaic_0001>
module attributes {stable_mosaic.version = 11 : i64} {
  func.func @_retinal_dn_kernel(%arg0: i32, %arg1: i32, %arg2: memref<1x16x16xf32, #tpu.memory_space<vmem>>, %arg3: memref<1x8x16xf32, #tpu.memory_space<vmem>>, %arg4: memref<77xf32, #tpu.memory_space<smem>>, %arg5: memref<1x16x16xf32, #tpu.memory_space<vmem>>, %arg6: memref<24x20xf32, #tpu.memory_space<vmem>>) attributes {dimension_semantics = [#tpu.dimension_semantics<parallel>, #tpu.dimension_semantics<parallel>], iteration_bounds = array<i64: 2, 1>, scalar_prefetch = 0 : i64, scratch_operands = 1 : i64, tpu.core_type = #tpu.core_type<tc>, window_params = [{transform_indices = @transform_0, window_bounds = array<i64: 1, 16, 16>}, {transform_indices = @transform_1, window_bounds = array<i64: 1, 8, 16>}, {transform_indices = @transform_2, window_bounds = array<i64: 77>}, {transform_indices = @transform_3, window_bounds = array<i64: 1, 16, 16>}]} {
    %c0 = arith.constant 0 : index
    %c0_0 = arith.constant 0 : index
    %c0_1 = arith.constant 0 : index
    %0 = vector.load %arg2[%c0, %c0_0, %c0_1] : memref<1x16x16xf32, #tpu.memory_space<vmem>>, vector<1x16x16xf32>
    %1 = vector.shape_cast %0 : vector<1x16x16xf32> to vector<16x16xf32>
    %c0_2 = arith.constant 0 : index
    %c2 = arith.constant 2 : index
    %2 = vector.load %arg6[%c0_2, %c2] : memref<24x20xf32, #tpu.memory_space<vmem>>, vector<16x16xf32>
    tpu.vector_store %arg6[%c0_2, %c2], %1 {strides = array<i32>} : memref<24x20xf32, #tpu.memory_space<vmem>>, vector<16x16xf32>,
    %c0_3 = arith.constant 0 : index
    %c0_4 = arith.constant 0 : index
    %c0_5 = arith.constant 0 : index
    %3 = vector.load %arg3[%c0_3, %c0_4, %c0_5] : memref<1x8x16xf32, #tpu.memory_space<vmem>>, vector<1x8x16xf32>
    %4 = vector.shape_cast %3 : vector<1x8x16xf32> to vector<8x16xf32>
    %c16 = arith.constant 16 : index
    %c2_6 = arith.constant 2 : index
    %5 = vector.load %arg6[%c16, %c2_6] : memref<24x20xf32, #tpu.memory_space<vmem>>, vector<8x16xf32>
    tpu.vector_store %arg6[%c16, %c2_6], %4 {strides = array<i32>} : memref<24x20xf32, #tpu.memory_space<vmem>>, vector<8x16xf32>,
    %c0_7 = arith.constant 0 : index
    %c2_8 = arith.constant 2 : index
    %6 = vector.load %arg6[%c0_7, %c2_8] : memref<24x20xf32, #tpu.memory_space<vmem>>, vector<24x1xf32>
    %7 = vector.shape_cast %6 : vector<24x1xf32> to vector<24x1xf32>
    %8 = vector.broadcast %7 : vector<24x1xf32> to vector<24x2xf32>
    %c0_9 = arith.constant 0 : index
    %c0_10 = arith.constant 0 : index
    %9 = vector.load %arg6[%c0_9, %c0_10] : memref<24x20xf32, #tpu.memory_space<vmem>>, vector<24x2xf32>
    tpu.vector_store %arg6[%c0_9, %c0_10], %8 {strides = array<i32>} : memref<24x20xf32, #tpu.memory_space<vmem>>, vector<24x2xf32>,
    %c0_11 = arith.constant 0 : index
    %c17 = arith.constant 17 : index
    %10 = vector.load %arg6[%c0_11, %c17] : memref<24x20xf32, #tpu.memory_space<vmem>>, vector<24x1xf32>
    %11 = vector.shape_cast %10 : vector<24x1xf32> to vector<24x1xf32>
    %12 = vector.broadcast %11 : vector<24x1xf32> to vector<24x2xf32>
    %c0_12 = arith.constant 0 : index
    %c18 = arith.constant 18 : index
    %13 = vector.load %arg6[%c0_12, %c18] : memref<24x20xf32, #tpu.memory_space<vmem>>, vector<24x2xf32>
    tpu.vector_store %arg6[%c0_12, %c18], %12 {strides = array<i32>} : memref<24x20xf32, #tpu.memory_space<vmem>>, vector<24x2xf32>,
    %cst = arith.constant 0.000000e+00 : f32
    %14 = vector.broadcast %cst : f32 to vector<20x16xf32>
    %cst_13 = arith.constant 0.000000e+00 : f32
    %15 = vector.broadcast %cst_13 : f32 to vector<20x16xf32>
    %c0_14 = arith.constant 0 : index
    %c0_15 = arith.constant 0 : index
    %16 = vector.load %arg6[%c0_14, %c0_15] : memref<24x20xf32, #tpu.memory_space<vmem>>, vector<20x16xf32>
    %c0_16 = arith.constant 0 : index
    %17 = memref.load %arg4[%c0_16] : memref<77xf32, #tpu.memory_space<smem>>
    %18 = vector.broadcast %17 : f32 to vector<20x16xf32>
    %19 = arith.mulf %18, %16 : vector<20x16xf32>
    %20 = arith.addf %14, %19 : vector<20x16xf32>
    %c25 = arith.constant 25 : index
    %21 = memref.load %arg4[%c25] : memref<77xf32, #tpu.memory_space<smem>>
    %22 = vector.broadcast %21 : f32 to vector<20x16xf32>
    %23 = arith.mulf %22, %16 : vector<20x16xf32>
    %24 = arith.addf %15, %23 : vector<20x16xf32>
    %c1 = arith.constant 1 : index
    %c0_17 = arith.constant 0 : index
    %25 = vector.load %arg6[%c1, %c0_17] : memref<24x20xf32, #tpu.memory_space<vmem>>, vector<20x16xf32>
    %c5 = arith.constant 5 : index
    %26 = memref.load %arg4[%c5] : memref<77xf32, #tpu.memory_space<smem>>
    %27 = vector.broadcast %26 : f32 to vector<20x16xf32>
    %28 = arith.mulf %27, %25 : vector<20x16xf32>
    %29 = arith.addf %20, %28 : vector<20x16xf32>
    %c30 = arith.constant 30 : index
    %30 = memref.load %arg4[%c30] : memref<77xf32, #tpu.memory_space<smem>>
    %31 = vector.broadcast %30 : f32 to vector<20x16xf32>
    %32 = arith.mulf %31, %25 : vector<20x16xf32>
    %33 = arith.addf %24, %32 : vector<20x16xf32>
    %c2_18 = arith.constant 2 : index
    %c0_19 = arith.constant 0 : index
    %34 = vector.load %arg6[%c2_18, %c0_19] : memref<24x20xf32, #tpu.memory_space<vmem>>, vector<20x16xf32>
    %c10 = arith.constant 10 : index
    %35 = memref.load %arg4[%c10] : memref<77xf32, #tpu.memory_space<smem>>
    %36 = vector.broadcast %35 : f32 to vector<20x16xf32>
    %37 = arith.mulf %36, %34 : vector<20x16xf32>
    %38 = arith.addf %29, %37 : vector<20x16xf32>
    %c35 = arith.constant 35 : index
    %39 = memref.load %arg4[%c35] : memref<77xf32, #tpu.memory_space<smem>>
    %40 = vector.broadcast %39 : f32 to vector<20x16xf32>
    %41 = arith.mulf %40, %34 : vector<20x16xf32>
    %42 = arith.addf %33, %41 : vector<20x16xf32>
    %c3 = arith.constant 3 : index
    %c0_20 = arith.constant 0 : index
    %43 = vector.load %arg6[%c3, %c0_20] : memref<24x20xf32, #tpu.memory_space<vmem>>, vector<20x16xf32>
    %c15 = arith.constant 15 : index
    %44 = memref.load %arg4[%c15] : memref<77xf32, #tpu.memory_space<smem>>
    %45 = vector.broadcast %44 : f32 to vector<20x16xf32>
    %46 = arith.mulf %45, %43 : vector<20x16xf32>
    %47 = arith.addf %38, %46 : vector<20x16xf32>
    %c40 = arith.constant 40 : index
    %48 = memref.load %arg4[%c40] : memref<77xf32, #tpu.memory_space<smem>>
    %49 = vector.broadcast %48 : f32 to vector<20x16xf32>
    %50 = arith.mulf %49, %43 : vector<20x16xf32>
    %51 = arith.addf %42, %50 : vector<20x16xf32>
    %c4 = arith.constant 4 : index
    %c0_21 = arith.constant 0 : index
    %52 = vector.load %arg6[%c4, %c0_21] : memref<24x20xf32, #tpu.memory_space<vmem>>, vector<20x16xf32>
    %c20 = arith.constant 20 : index
    %53 = memref.load %arg4[%c20] : memref<77xf32, #tpu.memory_space<smem>>
    %54 = vector.broadcast %53 : f32 to vector<20x16xf32>
    %55 = arith.mulf %54, %52 : vector<20x16xf32>
    %56 = arith.addf %47, %55 : vector<20x16xf32>
    %c45 = arith.constant 45 : index
    %57 = memref.load %arg4[%c45] : memref<77xf32, #tpu.memory_space<smem>>
    %58 = vector.broadcast %57 : f32 to vector<20x16xf32>
    %59 = arith.mulf %58, %52 : vector<20x16xf32>
    %60 = arith.addf %51, %59 : vector<20x16xf32>
    %c0_22 = arith.constant 0 : index
    %c1_23 = arith.constant 1 : index
    %61 = vector.load %arg6[%c0_22, %c1_23] : memref<24x20xf32, #tpu.memory_space<vmem>>, vector<20x16xf32>
    %c1_24 = arith.constant 1 : index
    %62 = memref.load %arg4[%c1_24] : memref<77xf32, #tpu.memory_space<smem>>
    %63 = vector.broadcast %62 : f32 to vector<20x16xf32>
    %64 = arith.mulf %63, %61 : vector<20x16xf32>
    %65 = arith.addf %56, %64 : vector<20x16xf32>
    %c26 = arith.constant 26 : index
    %66 = memref.load %arg4[%c26] : memref<77xf32, #tpu.memory_space<smem>>
    %67 = vector.broadcast %66 : f32 to vector<20x16xf32>
    %68 = arith.mulf %67, %61 : vector<20x16xf32>
    %69 = arith.addf %60, %68 : vector<20x16xf32>
    %c1_25 = arith.constant 1 : index
    %c1_26 = arith.constant 1 : index
    %70 = vector.load %arg6[%c1_25, %c1_26] : memref<24x20xf32, #tpu.memory_space<vmem>>, vector<20x16xf32>
    %c6 = arith.constant 6 : index
    %71 = memref.load %arg4[%c6] : memref<77xf32, #tpu.memory_space<smem>>
    %72 = vector.broadcast %71 : f32 to vector<20x16xf32>
    %73 = arith.mulf %72, %70 : vector<20x16xf32>
    %74 = arith.addf %65, %73 : vector<20x16xf32>
    %c31 = arith.constant 31 : index
    %75 = memref.load %arg4[%c31] : memref<77xf32, #tpu.memory_space<smem>>
    %76 = vector.broadcast %75 : f32 to vector<20x16xf32>
    %77 = arith.mulf %76, %70 : vector<20x16xf32>
    %78 = arith.addf %69, %77 : vector<20x16xf32>
    %c2_27 = arith.constant 2 : index
    %c1_28 = arith.constant 1 : index
    %79 = vector.load %arg6[%c2_27, %c1_28] : memref<24x20xf32, #tpu.memory_space<vmem>>, vector<20x16xf32>
    %c11 = arith.constant 11 : index
    %80 = memref.load %arg4[%c11] : memref<77xf32, #tpu.memory_space<smem>>
    %81 = vector.broadcast %80 : f32 to vector<20x16xf32>
    %82 = arith.mulf %81, %79 : vector<20x16xf32>
    %83 = arith.addf %74, %82 : vector<20x16xf32>
    %c36 = arith.constant 36 : index
    %84 = memref.load %arg4[%c36] : memref<77xf32, #tpu.memory_space<smem>>
    %85 = vector.broadcast %84 : f32 to vector<20x16xf32>
    %86 = arith.mulf %85, %79 : vector<20x16xf32>
    %87 = arith.addf %78, %86 : vector<20x16xf32>
    %c3_29 = arith.constant 3 : index
    %c1_30 = arith.constant 1 : index
    %88 = vector.load %arg6[%c3_29, %c1_30] : memref<24x20xf32, #tpu.memory_space<vmem>>, vector<20x16xf32>
    %c16_31 = arith.constant 16 : index
    %89 = memref.load %arg4[%c16_31] : memref<77xf32, #tpu.memory_space<smem>>
    %90 = vector.broadcast %89 : f32 to vector<20x16xf32>
    %91 = arith.mulf %90, %88 : vector<20x16xf32>
    %92 = arith.addf %83, %91 : vector<20x16xf32>
    %c41 = arith.constant 41 : index
    %93 = memref.load %arg4[%c41] : memref<77xf32, #tpu.memory_space<smem>>
    %94 = vector.broadcast %93 : f32 to vector<20x16xf32>
    %95 = arith.mulf %94, %88 : vector<20x16xf32>
    %96 = arith.addf %87, %95 : vector<20x16xf32>
    %c4_32 = arith.constant 4 : index
    %c1_33 = arith.constant 1 : index
    %97 = vector.load %arg6[%c4_32, %c1_33] : memref<24x20xf32, #tpu.memory_space<vmem>>, vector<20x16xf32>
    %c21 = arith.constant 21 : index
    %98 = memref.load %arg4[%c21] : memref<77xf32, #tpu.memory_space<smem>>
    %99 = vector.broadcast %98 : f32 to vector<20x16xf32>
    %100 = arith.mulf %99, %97 : vector<20x16xf32>
    %101 = arith.addf %92, %100 : vector<20x16xf32>
    %c46 = arith.constant 46 : index
    %102 = memref.load %arg4[%c46] : memref<77xf32, #tpu.memory_space<smem>>
    %103 = vector.broadcast %102 : f32 to vector<20x16xf32>
    %104 = arith.mulf %103, %97 : vector<20x16xf32>
    %105 = arith.addf %96, %104 : vector<20x16xf32>
    %c0_34 = arith.constant 0 : index
    %c2_35 = arith.constant 2 : index
    %106 = vector.load %arg6[%c0_34, %c2_35] : memref<24x20xf32, #tpu.memory_space<vmem>>, vector<20x16xf32>
    %c2_36 = arith.constant 2 : index
    %107 = memref.load %arg4[%c2_36] : memref<77xf32, #tpu.memory_space<smem>>
    %108 = vector.broadcast %107 : f32 to vector<20x16xf32>
    %109 = arith.mulf %108, %106 : vector<20x16xf32>
    %110 = arith.addf %101, %109 : vector<20x16xf32>
    %c27 = arith.constant 27 : index
    %111 = memref.load %arg4[%c27] : memref<77xf32, #tpu.memory_space<smem>>
    %112 = vector.broadcast %111 : f32 to vector<20x16xf32>
    %113 = arith.mulf %112, %106 : vector<20x16xf32>
    %114 = arith.addf %105, %113 : vector<20x16xf32>
    %c1_37 = arith.constant 1 : index
    %c2_38 = arith.constant 2 : index
    %115 = vector.load %arg6[%c1_37, %c2_38] : memref<24x20xf32, #tpu.memory_space<vmem>>, vector<20x16xf32>
    %c7 = arith.constant 7 : index
    %116 = memref.load %arg4[%c7] : memref<77xf32, #tpu.memory_space<smem>>
    %117 = vector.broadcast %116 : f32 to vector<20x16xf32>
    %118 = arith.mulf %117, %115 : vector<20x16xf32>
    %119 = arith.addf %110, %118 : vector<20x16xf32>
    %c32 = arith.constant 32 : index
    %120 = memref.load %arg4[%c32] : memref<77xf32, #tpu.memory_space<smem>>
    %121 = vector.broadcast %120 : f32 to vector<20x16xf32>
    %122 = arith.mulf %121, %115 : vector<20x16xf32>
    %123 = arith.addf %114, %122 : vector<20x16xf32>
    %c2_39 = arith.constant 2 : index
    %c2_40 = arith.constant 2 : index
    %124 = vector.load %arg6[%c2_39, %c2_40] : memref<24x20xf32, #tpu.memory_space<vmem>>, vector<20x16xf32>
    %c12 = arith.constant 12 : index
    %125 = memref.load %arg4[%c12] : memref<77xf32, #tpu.memory_space<smem>>
    %126 = vector.broadcast %125 : f32 to vector<20x16xf32>
    %127 = arith.mulf %126, %124 : vector<20x16xf32>
    %128 = arith.addf %119, %127 : vector<20x16xf32>
    %c37 = arith.constant 37 : index
    %129 = memref.load %arg4[%c37] : memref<77xf32, #tpu.memory_space<smem>>
    %130 = vector.broadcast %129 : f32 to vector<20x16xf32>
    %131 = arith.mulf %130, %124 : vector<20x16xf32>
    %132 = arith.addf %123, %131 : vector<20x16xf32>
    %c3_41 = arith.constant 3 : index
    %c2_42 = arith.constant 2 : index
    %133 = vector.load %arg6[%c3_41, %c2_42] : memref<24x20xf32, #tpu.memory_space<vmem>>, vector<20x16xf32>
    %c17_43 = arith.constant 17 : index
    %134 = memref.load %arg4[%c17_43] : memref<77xf32, #tpu.memory_space<smem>>
    %135 = vector.broadcast %134 : f32 to vector<20x16xf32>
    %136 = arith.mulf %135, %133 : vector<20x16xf32>
    %137 = arith.addf %128, %136 : vector<20x16xf32>
    %c42 = arith.constant 42 : index
    %138 = memref.load %arg4[%c42] : memref<77xf32, #tpu.memory_space<smem>>
    %139 = vector.broadcast %138 : f32 to vector<20x16xf32>
    %140 = arith.mulf %139, %133 : vector<20x16xf32>
    %141 = arith.addf %132, %140 : vector<20x16xf32>
    %c4_44 = arith.constant 4 : index
    %c2_45 = arith.constant 2 : index
    %142 = vector.load %arg6[%c4_44, %c2_45] : memref<24x20xf32, #tpu.memory_space<vmem>>, vector<20x16xf32>
    %c22 = arith.constant 22 : index
    %143 = memref.load %arg4[%c22] : memref<77xf32, #tpu.memory_space<smem>>
    %144 = vector.broadcast %143 : f32 to vector<20x16xf32>
    %145 = arith.mulf %144, %142 : vector<20x16xf32>
    %146 = arith.addf %137, %145 : vector<20x16xf32>
    %c47 = arith.constant 47 : index
    %147 = memref.load %arg4[%c47] : memref<77xf32, #tpu.memory_space<smem>>
    %148 = vector.broadcast %147 : f32 to vector<20x16xf32>
    %149 = arith.mulf %148, %142 : vector<20x16xf32>
    %150 = arith.addf %141, %149 : vector<20x16xf32>
    %c0_46 = arith.constant 0 : index
    %c3_47 = arith.constant 3 : index
    %151 = vector.load %arg6[%c0_46, %c3_47] : memref<24x20xf32, #tpu.memory_space<vmem>>, vector<20x16xf32>
    %c3_48 = arith.constant 3 : index
    %152 = memref.load %arg4[%c3_48] : memref<77xf32, #tpu.memory_space<smem>>
    %153 = vector.broadcast %152 : f32 to vector<20x16xf32>
    %154 = arith.mulf %153, %151 : vector<20x16xf32>
    %155 = arith.addf %146, %154 : vector<20x16xf32>
    %c28 = arith.constant 28 : index
    %156 = memref.load %arg4[%c28] : memref<77xf32, #tpu.memory_space<smem>>
    %157 = vector.broadcast %156 : f32 to vector<20x16xf32>
    %158 = arith.mulf %157, %151 : vector<20x16xf32>
    %159 = arith.addf %150, %158 : vector<20x16xf32>
    %c1_49 = arith.constant 1 : index
    %c3_50 = arith.constant 3 : index
    %160 = vector.load %arg6[%c1_49, %c3_50] : memref<24x20xf32, #tpu.memory_space<vmem>>, vector<20x16xf32>
    %c8 = arith.constant 8 : index
    %161 = memref.load %arg4[%c8] : memref<77xf32, #tpu.memory_space<smem>>
    %162 = vector.broadcast %161 : f32 to vector<20x16xf32>
    %163 = arith.mulf %162, %160 : vector<20x16xf32>
    %164 = arith.addf %155, %163 : vector<20x16xf32>
    %c33 = arith.constant 33 : index
    %165 = memref.load %arg4[%c33] : memref<77xf32, #tpu.memory_space<smem>>
    %166 = vector.broadcast %165 : f32 to vector<20x16xf32>
    %167 = arith.mulf %166, %160 : vector<20x16xf32>
    %168 = arith.addf %159, %167 : vector<20x16xf32>
    %c2_51 = arith.constant 2 : index
    %c3_52 = arith.constant 3 : index
    %169 = vector.load %arg6[%c2_51, %c3_52] : memref<24x20xf32, #tpu.memory_space<vmem>>, vector<20x16xf32>
    %c13 = arith.constant 13 : index
    %170 = memref.load %arg4[%c13] : memref<77xf32, #tpu.memory_space<smem>>
    %171 = vector.broadcast %170 : f32 to vector<20x16xf32>
    %172 = arith.mulf %171, %169 : vector<20x16xf32>
    %173 = arith.addf %164, %172 : vector<20x16xf32>
    %c38 = arith.constant 38 : index
    %174 = memref.load %arg4[%c38] : memref<77xf32, #tpu.memory_space<smem>>
    %175 = vector.broadcast %174 : f32 to vector<20x16xf32>
    %176 = arith.mulf %175, %169 : vector<20x16xf32>
    %177 = arith.addf %168, %176 : vector<20x16xf32>
    %c3_53 = arith.constant 3 : index
    %c3_54 = arith.constant 3 : index
    %178 = vector.load %arg6[%c3_53, %c3_54] : memref<24x20xf32, #tpu.memory_space<vmem>>, vector<20x16xf32>
    %c18_55 = arith.constant 18 : index
    %179 = memref.load %arg4[%c18_55] : memref<77xf32, #tpu.memory_space<smem>>
    %180 = vector.broadcast %179 : f32 to vector<20x16xf32>
    %181 = arith.mulf %180, %178 : vector<20x16xf32>
    %182 = arith.addf %173, %181 : vector<20x16xf32>
    %c43 = arith.constant 43 : index
    %183 = memref.load %arg4[%c43] : memref<77xf32, #tpu.memory_space<smem>>
    %184 = vector.broadcast %183 : f32 to vector<20x16xf32>
    %185 = arith.mulf %184, %178 : vector<20x16xf32>
    %186 = arith.addf %177, %185 : vector<20x16xf32>
    %c4_56 = arith.constant 4 : index
    %c3_57 = arith.constant 3 : index
    %187 = vector.load %arg6[%c4_56, %c3_57] : memref<24x20xf32, #tpu.memory_space<vmem>>, vector<20x16xf32>
    %c23 = arith.constant 23 : index
    %188 = memref.load %arg4[%c23] : memref<77xf32, #tpu.memory_space<smem>>
    %189 = vector.broadcast %188 : f32 to vector<20x16xf32>
    %190 = arith.mulf %189, %187 : vector<20x16xf32>
    %191 = arith.addf %182, %190 : vector<20x16xf32>
    %c48 = arith.constant 48 : index
    %192 = memref.load %arg4[%c48] : memref<77xf32, #tpu.memory_space<smem>>
    %193 = vector.broadcast %192 : f32 to vector<20x16xf32>
    %194 = arith.mulf %193, %187 : vector<20x16xf32>
    %195 = arith.addf %186, %194 : vector<20x16xf32>
    %c0_58 = arith.constant 0 : index
    %c4_59 = arith.constant 4 : index
    %196 = vector.load %arg6[%c0_58, %c4_59] : memref<24x20xf32, #tpu.memory_space<vmem>>, vector<20x16xf32>
    %c4_60 = arith.constant 4 : index
    %197 = memref.load %arg4[%c4_60] : memref<77xf32, #tpu.memory_space<smem>>
    %198 = vector.broadcast %197 : f32 to vector<20x16xf32>
    %199 = arith.mulf %198, %196 : vector<20x16xf32>
    %200 = arith.addf %191, %199 : vector<20x16xf32>
    %c29 = arith.constant 29 : index
    %201 = memref.load %arg4[%c29] : memref<77xf32, #tpu.memory_space<smem>>
    %202 = vector.broadcast %201 : f32 to vector<20x16xf32>
    %203 = arith.mulf %202, %196 : vector<20x16xf32>
    %204 = arith.addf %195, %203 : vector<20x16xf32>
    %c1_61 = arith.constant 1 : index
    %c4_62 = arith.constant 4 : index
    %205 = vector.load %arg6[%c1_61, %c4_62] : memref<24x20xf32, #tpu.memory_space<vmem>>, vector<20x16xf32>
    %c9 = arith.constant 9 : index
    %206 = memref.load %arg4[%c9] : memref<77xf32, #tpu.memory_space<smem>>
    %207 = vector.broadcast %206 : f32 to vector<20x16xf32>
    %208 = arith.mulf %207, %205 : vector<20x16xf32>
    %209 = arith.addf %200, %208 : vector<20x16xf32>
    %c34 = arith.constant 34 : index
    %210 = memref.load %arg4[%c34] : memref<77xf32, #tpu.memory_space<smem>>
    %211 = vector.broadcast %210 : f32 to vector<20x16xf32>
    %212 = arith.mulf %211, %205 : vector<20x16xf32>
    %213 = arith.addf %204, %212 : vector<20x16xf32>
    %c2_63 = arith.constant 2 : index
    %c4_64 = arith.constant 4 : index
    %214 = vector.load %arg6[%c2_63, %c4_64] : memref<24x20xf32, #tpu.memory_space<vmem>>, vector<20x16xf32>
    %c14 = arith.constant 14 : index
    %215 = memref.load %arg4[%c14] : memref<77xf32, #tpu.memory_space<smem>>
    %216 = vector.broadcast %215 : f32 to vector<20x16xf32>
    %217 = arith.mulf %216, %214 : vector<20x16xf32>
    %218 = arith.addf %209, %217 : vector<20x16xf32>
    %c39 = arith.constant 39 : index
    %219 = memref.load %arg4[%c39] : memref<77xf32, #tpu.memory_space<smem>>
    %220 = vector.broadcast %219 : f32 to vector<20x16xf32>
    %221 = arith.mulf %220, %214 : vector<20x16xf32>
    %222 = arith.addf %213, %221 : vector<20x16xf32>
    %c3_65 = arith.constant 3 : index
    %c4_66 = arith.constant 4 : index
    %223 = vector.load %arg6[%c3_65, %c4_66] : memref<24x20xf32, #tpu.memory_space<vmem>>, vector<20x16xf32>
    %c19 = arith.constant 19 : index
    %224 = memref.load %arg4[%c19] : memref<77xf32, #tpu.memory_space<smem>>
    %225 = vector.broadcast %224 : f32 to vector<20x16xf32>
    %226 = arith.mulf %225, %223 : vector<20x16xf32>
    %227 = arith.addf %218, %226 : vector<20x16xf32>
    %c44 = arith.constant 44 : index
    %228 = memref.load %arg4[%c44] : memref<77xf32, #tpu.memory_space<smem>>
    %229 = vector.broadcast %228 : f32 to vector<20x16xf32>
    %230 = arith.mulf %229, %223 : vector<20x16xf32>
    %231 = arith.addf %222, %230 : vector<20x16xf32>
    %c4_67 = arith.constant 4 : index
    %c4_68 = arith.constant 4 : index
    %232 = vector.load %arg6[%c4_67, %c4_68] : memref<24x20xf32, #tpu.memory_space<vmem>>, vector<20x16xf32>
    %c24 = arith.constant 24 : index
    %233 = memref.load %arg4[%c24] : memref<77xf32, #tpu.memory_space<smem>>
    %234 = vector.broadcast %233 : f32 to vector<20x16xf32>
    %235 = arith.mulf %234, %232 : vector<20x16xf32>
    %236 = arith.addf %227, %235 : vector<20x16xf32>
    %c49 = arith.constant 49 : index
    %237 = memref.load %arg4[%c49] : memref<77xf32, #tpu.memory_space<smem>>
    %238 = vector.broadcast %237 : f32 to vector<20x16xf32>
    %239 = arith.mulf %238, %232 : vector<20x16xf32>
    %240 = arith.addf %231, %239 : vector<20x16xf32>
    %c75 = arith.constant 75 : index
    %241 = memref.load %arg4[%c75] : memref<77xf32, #tpu.memory_space<smem>>
    %242 = vector.broadcast %241 : f32 to vector<20x16xf32>
    %243 = arith.mulf %242, %240 : vector<20x16xf32>
    %cst_69 = arith.constant 1.000000e+00 : f32
    %244 = vector.broadcast %cst_69 : f32 to vector<20x16xf32>
    %245 = arith.addf %244, %243 : vector<20x16xf32>
    %246 = tpu.reciprocal %245 {approx = true} : vector<20x16xf32> -> vector<20x16xf32>
    %247 = arith.mulf %245, %246 : vector<20x16xf32>
    %cst_70 = arith.constant 2.000000e+00 : f32
    %248 = vector.broadcast %cst_70 : f32 to vector<20x16xf32>
    %249 = arith.subf %248, %247 : vector<20x16xf32>
    %250 = arith.mulf %246, %249 : vector<20x16xf32>
    %251 = arith.mulf %245, %250 : vector<20x16xf32>
    %cst_71 = arith.constant 2.000000e+00 : f32
    %252 = vector.broadcast %cst_71 : f32 to vector<20x16xf32>
    %253 = arith.subf %252, %251 : vector<20x16xf32>
    %254 = arith.mulf %250, %253 : vector<20x16xf32>
    %255 = arith.mulf %236, %254 : vector<20x16xf32>
    %256 = arith.mulf %255, %255 : vector<20x16xf32>
    %c0_72 = arith.constant 0 : index
    %c2_73 = arith.constant 2 : index
    %257 = vector.load %arg6[%c0_72, %c2_73] : memref<24x20xf32, #tpu.memory_space<vmem>>, vector<20x16xf32>
    tpu.vector_store %arg6[%c0_72, %c2_73], %256 {strides = array<i32>} : memref<24x20xf32, #tpu.memory_space<vmem>>, vector<20x16xf32>,
    %c0_i32 = arith.constant 0 : i32
    %258 = arith.cmpi eq, %arg1, %c0_i32 : i32
    %259 = arith.extui %258 : i1 to i32
    %c0_i32_74 = arith.constant 0 : i32
    %260 = arith.cmpi ne, %259, %c0_i32_74 : i32
    scf.if %260 {
      %427 = vector.extract_strided_slice %256 {offsets = [2, 0], sizes = [1, 16], strides = [1, 1]} : vector<20x16xf32> to vector<1x16xf32>
      %428 = vector.shape_cast %427 : vector<1x16xf32> to vector<1x16xf32>
      %429 = vector.broadcast %428 : vector<1x16xf32> to vector<2x16xf32>
      %c0_145 = arith.constant 0 : index
      %c2_146 = arith.constant 2 : index
      %430 = vector.load %arg6[%c0_145, %c2_146] : memref<24x20xf32, #tpu.memory_space<vmem>>, vector<2x16xf32>
      tpu.vector_store %arg6[%c0_145, %c2_146], %429 {strides = array<i32>} : memref<24x20xf32, #tpu.memory_space<vmem>>, vector<2x16xf32>,
    } else {
    }
    %c0_i32_75 = arith.constant 0 : i32
    %261 = arith.cmpi eq, %arg1, %c0_i32_75 : i32
    %262 = arith.extui %261 : i1 to i32
    %c0_i32_76 = arith.constant 0 : i32
    %263 = arith.cmpi ne, %262, %c0_i32_76 : i32
    scf.if %263 {
      %427 = vector.extract_strided_slice %256 {offsets = [17, 0], sizes = [1, 16], strides = [1, 1]} : vector<20x16xf32> to vector<1x16xf32>
      %428 = vector.shape_cast %427 : vector<1x16xf32> to vector<1x16xf32>
      %429 = vector.broadcast %428 : vector<1x16xf32> to vector<2x16xf32>
      %c18_145 = arith.constant 18 : index
      %c2_146 = arith.constant 2 : index
      %430 = vector.load %arg6[%c18_145, %c2_146] : memref<24x20xf32, #tpu.memory_space<vmem>>, vector<2x16xf32>
      tpu.vector_store %arg6[%c18_145, %c2_146], %429 {strides = array<i32>} : memref<24x20xf32, #tpu.memory_space<vmem>>, vector<2x16xf32>,
    } else {
    }
    %c0_77 = arith.constant 0 : index
    %c2_78 = arith.constant 2 : index
    %264 = vector.load %arg6[%c0_77, %c2_78] : memref<24x20xf32, #tpu.memory_space<vmem>>, vector<20x1xf32>
    %265 = vector.shape_cast %264 : vector<20x1xf32> to vector<20x1xf32>
    %266 = vector.broadcast %265 : vector<20x1xf32> to vector<20x2xf32>
    %c0_79 = arith.constant 0 : index
    %c0_80 = arith.constant 0 : index
    %267 = vector.load %arg6[%c0_79, %c0_80] : memref<24x20xf32, #tpu.memory_space<vmem>>, vector<20x2xf32>
    tpu.vector_store %arg6[%c0_79, %c0_80], %266 {strides = array<i32>} : memref<24x20xf32, #tpu.memory_space<vmem>>, vector<20x2xf32>,
    %c0_81 = arith.constant 0 : index
    %c17_82 = arith.constant 17 : index
    %268 = vector.load %arg6[%c0_81, %c17_82] : memref<24x20xf32, #tpu.memory_space<vmem>>, vector<20x1xf32>
    %269 = vector.shape_cast %268 : vector<20x1xf32> to vector<20x1xf32>
    %270 = vector.broadcast %269 : vector<20x1xf32> to vector<20x2xf32>
    %c0_83 = arith.constant 0 : index
    %c18_84 = arith.constant 18 : index
    %271 = vector.load %arg6[%c0_83, %c18_84] : memref<24x20xf32, #tpu.memory_space<vmem>>, vector<20x2xf32>
    tpu.vector_store %arg6[%c0_83, %c18_84], %270 {strides = array<i32>} : memref<24x20xf32, #tpu.memory_space<vmem>>, vector<20x2xf32>,
    %cst_85 = arith.constant 0.000000e+00 : f32
    %272 = vector.broadcast %cst_85 : f32 to vector<16x16xf32>
    %c50 = arith.constant 50 : index
    %273 = memref.load %arg4[%c50] : memref<77xf32, #tpu.memory_space<smem>>
    %c0_86 = arith.constant 0 : index
    %c0_87 = arith.constant 0 : index
    %274 = vector.load %arg6[%c0_86, %c0_87] : memref<24x20xf32, #tpu.memory_space<vmem>>, vector<16x16xf32>
    %275 = vector.broadcast %273 : f32 to vector<16x16xf32>
    %276 = arith.mulf %275, %274 : vector<16x16xf32>
    %277 = arith.addf %272, %276 : vector<16x16xf32>
    %c55 = arith.constant 55 : index
    %278 = memref.load %arg4[%c55] : memref<77xf32, #tpu.memory_space<smem>>
    %c1_88 = arith.constant 1 : index
    %c0_89 = arith.constant 0 : index
    %279 = vector.load %arg6[%c1_88, %c0_89] : memref<24x20xf32, #tpu.memory_space<vmem>>, vector<16x16xf32>
    %280 = vector.broadcast %278 : f32 to vector<16x16xf32>
    %281 = arith.mulf %280, %279 : vector<16x16xf32>
    %282 = arith.addf %277, %281 : vector<16x16xf32>
    %c60 = arith.constant 60 : index
    %283 = memref.load %arg4[%c60] : memref<77xf32, #tpu.memory_space<smem>>
    %c2_90 = arith.constant 2 : index
    %c0_91 = arith.constant 0 : index
    %284 = vector.load %arg6[%c2_90, %c0_91] : memref<24x20xf32, #tpu.memory_space<vmem>>, vector<16x16xf32>
    %285 = vector.broadcast %283 : f32 to vector<16x16xf32>
    %286 = arith.mulf %285, %284 : vector<16x16xf32>
    %287 = arith.addf %282, %286 : vector<16x16xf32>
    %c65 = arith.constant 65 : index
    %288 = memref.load %arg4[%c65] : memref<77xf32, #tpu.memory_space<smem>>
    %c3_92 = arith.constant 3 : index
    %c0_93 = arith.constant 0 : index
    %289 = vector.load %arg6[%c3_92, %c0_93] : memref<24x20xf32, #tpu.memory_space<vmem>>, vector<16x16xf32>
    %290 = vector.broadcast %288 : f32 to vector<16x16xf32>
    %291 = arith.mulf %290, %289 : vector<16x16xf32>
    %292 = arith.addf %287, %291 : vector<16x16xf32>
    %c70 = arith.constant 70 : index
    %293 = memref.load %arg4[%c70] : memref<77xf32, #tpu.memory_space<smem>>
    %c4_94 = arith.constant 4 : index
    %c0_95 = arith.constant 0 : index
    %294 = vector.load %arg6[%c4_94, %c0_95] : memref<24x20xf32, #tpu.memory_space<vmem>>, vector<16x16xf32>
    %295 = vector.broadcast %293 : f32 to vector<16x16xf32>
    %296 = arith.mulf %295, %294 : vector<16x16xf32>
    %297 = arith.addf %292, %296 : vector<16x16xf32>
    %c51 = arith.constant 51 : index
    %298 = memref.load %arg4[%c51] : memref<77xf32, #tpu.memory_space<smem>>
    %c0_96 = arith.constant 0 : index
    %c1_97 = arith.constant 1 : index
    %299 = vector.load %arg6[%c0_96, %c1_97] : memref<24x20xf32, #tpu.memory_space<vmem>>, vector<16x16xf32>
    %300 = vector.broadcast %298 : f32 to vector<16x16xf32>
    %301 = arith.mulf %300, %299 : vector<16x16xf32>
    %302 = arith.addf %297, %301 : vector<16x16xf32>
    %c56 = arith.constant 56 : index
    %303 = memref.load %arg4[%c56] : memref<77xf32, #tpu.memory_space<smem>>
    %c1_98 = arith.constant 1 : index
    %c1_99 = arith.constant 1 : index
    %304 = vector.load %arg6[%c1_98, %c1_99] : memref<24x20xf32, #tpu.memory_space<vmem>>, vector<16x16xf32>
    %305 = vector.broadcast %303 : f32 to vector<16x16xf32>
    %306 = arith.mulf %305, %304 : vector<16x16xf32>
    %307 = arith.addf %302, %306 : vector<16x16xf32>
    %c61 = arith.constant 61 : index
    %308 = memref.load %arg4[%c61] : memref<77xf32, #tpu.memory_space<smem>>
    %c2_100 = arith.constant 2 : index
    %c1_101 = arith.constant 1 : index
    %309 = vector.load %arg6[%c2_100, %c1_101] : memref<24x20xf32, #tpu.memory_space<vmem>>, vector<16x16xf32>
    %310 = vector.broadcast %308 : f32 to vector<16x16xf32>
    %311 = arith.mulf %310, %309 : vector<16x16xf32>
    %312 = arith.addf %307, %311 : vector<16x16xf32>
    %c66 = arith.constant 66 : index
    %313 = memref.load %arg4[%c66] : memref<77xf32, #tpu.memory_space<smem>>
    %c3_102 = arith.constant 3 : index
    %c1_103 = arith.constant 1 : index
    %314 = vector.load %arg6[%c3_102, %c1_103] : memref<24x20xf32, #tpu.memory_space<vmem>>, vector<16x16xf32>
    %315 = vector.broadcast %313 : f32 to vector<16x16xf32>
    %316 = arith.mulf %315, %314 : vector<16x16xf32>
    %317 = arith.addf %312, %316 : vector<16x16xf32>
    %c71 = arith.constant 71 : index
    %318 = memref.load %arg4[%c71] : memref<77xf32, #tpu.memory_space<smem>>
    %c4_104 = arith.constant 4 : index
    %c1_105 = arith.constant 1 : index
    %319 = vector.load %arg6[%c4_104, %c1_105] : memref<24x20xf32, #tpu.memory_space<vmem>>, vector<16x16xf32>
    %320 = vector.broadcast %318 : f32 to vector<16x16xf32>
    %321 = arith.mulf %320, %319 : vector<16x16xf32>
    %322 = arith.addf %317, %321 : vector<16x16xf32>
    %c52 = arith.constant 52 : index
    %323 = memref.load %arg4[%c52] : memref<77xf32, #tpu.memory_space<smem>>
    %c0_106 = arith.constant 0 : index
    %c2_107 = arith.constant 2 : index
    %324 = vector.load %arg6[%c0_106, %c2_107] : memref<24x20xf32, #tpu.memory_space<vmem>>, vector<16x16xf32>
    %325 = vector.broadcast %323 : f32 to vector<16x16xf32>
    %326 = arith.mulf %325, %324 : vector<16x16xf32>
    %327 = arith.addf %322, %326 : vector<16x16xf32>
    %c57 = arith.constant 57 : index
    %328 = memref.load %arg4[%c57] : memref<77xf32, #tpu.memory_space<smem>>
    %c1_108 = arith.constant 1 : index
    %c2_109 = arith.constant 2 : index
    %329 = vector.load %arg6[%c1_108, %c2_109] : memref<24x20xf32, #tpu.memory_space<vmem>>, vector<16x16xf32>
    %330 = vector.broadcast %328 : f32 to vector<16x16xf32>
    %331 = arith.mulf %330, %329 : vector<16x16xf32>
    %332 = arith.addf %327, %331 : vector<16x16xf32>
    %c62 = arith.constant 62 : index
    %333 = memref.load %arg4[%c62] : memref<77xf32, #tpu.memory_space<smem>>
    %c2_110 = arith.constant 2 : index
    %c2_111 = arith.constant 2 : index
    %334 = vector.load %arg6[%c2_110, %c2_111] : memref<24x20xf32, #tpu.memory_space<vmem>>, vector<16x16xf32>
    %335 = vector.broadcast %333 : f32 to vector<16x16xf32>
    %336 = arith.mulf %335, %334 : vector<16x16xf32>
    %337 = arith.addf %332, %336 : vector<16x16xf32>
    %c67 = arith.constant 67 : index
    %338 = memref.load %arg4[%c67] : memref<77xf32, #tpu.memory_space<smem>>
    %c3_112 = arith.constant 3 : index
    %c2_113 = arith.constant 2 : index
    %339 = vector.load %arg6[%c3_112, %c2_113] : memref<24x20xf32, #tpu.memory_space<vmem>>, vector<16x16xf32>
    %340 = vector.broadcast %338 : f32 to vector<16x16xf32>
    %341 = arith.mulf %340, %339 : vector<16x16xf32>
    %342 = arith.addf %337, %341 : vector<16x16xf32>
    %c72 = arith.constant 72 : index
    %343 = memref.load %arg4[%c72] : memref<77xf32, #tpu.memory_space<smem>>
    %c4_114 = arith.constant 4 : index
    %c2_115 = arith.constant 2 : index
    %344 = vector.load %arg6[%c4_114, %c2_115] : memref<24x20xf32, #tpu.memory_space<vmem>>, vector<16x16xf32>
    %345 = vector.broadcast %343 : f32 to vector<16x16xf32>
    %346 = arith.mulf %345, %344 : vector<16x16xf32>
    %347 = arith.addf %342, %346 : vector<16x16xf32>
    %c53 = arith.constant 53 : index
    %348 = memref.load %arg4[%c53] : memref<77xf32, #tpu.memory_space<smem>>
    %c0_116 = arith.constant 0 : index
    %c3_117 = arith.constant 3 : index
    %349 = vector.load %arg6[%c0_116, %c3_117] : memref<24x20xf32, #tpu.memory_space<vmem>>, vector<16x16xf32>
    %350 = vector.broadcast %348 : f32 to vector<16x16xf32>
    %351 = arith.mulf %350, %349 : vector<16x16xf32>
    %352 = arith.addf %347, %351 : vector<16x16xf32>
    %c58 = arith.constant 58 : index
    %353 = memref.load %arg4[%c58] : memref<77xf32, #tpu.memory_space<smem>>
    %c1_118 = arith.constant 1 : index
    %c3_119 = arith.constant 3 : index
    %354 = vector.load %arg6[%c1_118, %c3_119] : memref<24x20xf32, #tpu.memory_space<vmem>>, vector<16x16xf32>
    %355 = vector.broadcast %353 : f32 to vector<16x16xf32>
    %356 = arith.mulf %355, %354 : vector<16x16xf32>
    %357 = arith.addf %352, %356 : vector<16x16xf32>
    %c63 = arith.constant 63 : index
    %358 = memref.load %arg4[%c63] : memref<77xf32, #tpu.memory_space<smem>>
    %c2_120 = arith.constant 2 : index
    %c3_121 = arith.constant 3 : index
    %359 = vector.load %arg6[%c2_120, %c3_121] : memref<24x20xf32, #tpu.memory_space<vmem>>, vector<16x16xf32>
    %360 = vector.broadcast %358 : f32 to vector<16x16xf32>
    %361 = arith.mulf %360, %359 : vector<16x16xf32>
    %362 = arith.addf %357, %361 : vector<16x16xf32>
    %c68 = arith.constant 68 : index
    %363 = memref.load %arg4[%c68] : memref<77xf32, #tpu.memory_space<smem>>
    %c3_122 = arith.constant 3 : index
    %c3_123 = arith.constant 3 : index
    %364 = vector.load %arg6[%c3_122, %c3_123] : memref<24x20xf32, #tpu.memory_space<vmem>>, vector<16x16xf32>
    %365 = vector.broadcast %363 : f32 to vector<16x16xf32>
    %366 = arith.mulf %365, %364 : vector<16x16xf32>
    %367 = arith.addf %362, %366 : vector<16x16xf32>
    %c73 = arith.constant 73 : index
    %368 = memref.load %arg4[%c73] : memref<77xf32, #tpu.memory_space<smem>>
    %c4_124 = arith.constant 4 : index
    %c3_125 = arith.constant 3 : index
    %369 = vector.load %arg6[%c4_124, %c3_125] : memref<24x20xf32, #tpu.memory_space<vmem>>, vector<16x16xf32>
    %370 = vector.broadcast %368 : f32 to vector<16x16xf32>
    %371 = arith.mulf %370, %369 : vector<16x16xf32>
    %372 = arith.addf %367, %371 : vector<16x16xf32>
    %c54 = arith.constant 54 : index
    %373 = memref.load %arg4[%c54] : memref<77xf32, #tpu.memory_space<smem>>
    %c0_126 = arith.constant 0 : index
    %c4_127 = arith.constant 4 : index
    %374 = vector.load %arg6[%c0_126, %c4_127] : memref<24x20xf32, #tpu.memory_space<vmem>>, vector<16x16xf32>
    %375 = vector.broadcast %373 : f32 to vector<16x16xf32>
    %376 = arith.mulf %375, %374 : vector<16x16xf32>
    %377 = arith.addf %372, %376 : vector<16x16xf32>
    %c59 = arith.constant 59 : index
    %378 = memref.load %arg4[%c59] : memref<77xf32, #tpu.memory_space<smem>>
    %c1_128 = arith.constant 1 : index
    %c4_129 = arith.constant 4 : index
    %379 = vector.load %arg6[%c1_128, %c4_129] : memref<24x20xf32, #tpu.memory_space<vmem>>, vector<16x16xf32>
    %380 = vector.broadcast %378 : f32 to vector<16x16xf32>
    %381 = arith.mulf %380, %379 : vector<16x16xf32>
    %382 = arith.addf %377, %381 : vector<16x16xf32>
    %c64 = arith.constant 64 : index
    %383 = memref.load %arg4[%c64] : memref<77xf32, #tpu.memory_space<smem>>
    %c2_130 = arith.constant 2 : index
    %c4_131 = arith.constant 4 : index
    %384 = vector.load %arg6[%c2_130, %c4_131] : memref<24x20xf32, #tpu.memory_space<vmem>>, vector<16x16xf32>
    %385 = vector.broadcast %383 : f32 to vector<16x16xf32>
    %386 = arith.mulf %385, %384 : vector<16x16xf32>
    %387 = arith.addf %382, %386 : vector<16x16xf32>
    %c69 = arith.constant 69 : index
    %388 = memref.load %arg4[%c69] : memref<77xf32, #tpu.memory_space<smem>>
    %c3_132 = arith.constant 3 : index
    %c4_133 = arith.constant 4 : index
    %389 = vector.load %arg6[%c3_132, %c4_133] : memref<24x20xf32, #tpu.memory_space<vmem>>, vector<16x16xf32>
    %390 = vector.broadcast %388 : f32 to vector<16x16xf32>
    %391 = arith.mulf %390, %389 : vector<16x16xf32>
    %392 = arith.addf %387, %391 : vector<16x16xf32>
    %c74 = arith.constant 74 : index
    %393 = memref.load %arg4[%c74] : memref<77xf32, #tpu.memory_space<smem>>
    %c4_134 = arith.constant 4 : index
    %c4_135 = arith.constant 4 : index
    %394 = vector.load %arg6[%c4_134, %c4_135] : memref<24x20xf32, #tpu.memory_space<vmem>>, vector<16x16xf32>
    %395 = vector.broadcast %393 : f32 to vector<16x16xf32>
    %396 = arith.mulf %395, %394 : vector<16x16xf32>
    %397 = arith.addf %392, %396 : vector<16x16xf32>
    %cst_136 = arith.constant 9.99999997E-7 : f32
    %398 = vector.broadcast %cst_136 : f32 to vector<16x16xf32>
    %399 = arith.addf %397, %398 : vector<16x16xf32>
    %400 = math.sqrt %399 : vector<16x16xf32>
    %c76 = arith.constant 76 : index
    %401 = memref.load %arg4[%c76] : memref<77xf32, #tpu.memory_space<smem>>
    %402 = vector.extract_strided_slice %255 {offsets = [2, 0], sizes = [16, 16], strides = [1, 1]} : vector<20x16xf32> to vector<16x16xf32>
    %403 = vector.broadcast %401 : f32 to vector<16x16xf32>
    %404 = arith.mulf %403, %400 : vector<16x16xf32>
    %cst_137 = arith.constant 1.000000e+00 : f32
    %405 = vector.broadcast %cst_137 : f32 to vector<16x16xf32>
    %406 = arith.addf %405, %404 : vector<16x16xf32>
    %407 = tpu.reciprocal %406 {approx = true} : vector<16x16xf32> -> vector<16x16xf32>
    %408 = arith.mulf %406, %407 : vector<16x16xf32>
    %cst_138 = arith.constant 2.000000e+00 : f32
    %409 = vector.broadcast %cst_138 : f32 to vector<16x16xf32>
    %410 = arith.subf %409, %408 : vector<16x16xf32>
    %411 = arith.mulf %407, %410 : vector<16x16xf32>
    %412 = arith.mulf %406, %411 : vector<16x16xf32>
    %cst_139 = arith.constant 2.000000e+00 : f32
    %413 = vector.broadcast %cst_139 : f32 to vector<16x16xf32>
    %414 = arith.subf %413, %412 : vector<16x16xf32>
    %415 = arith.mulf %411, %414 : vector<16x16xf32>
    %416 = arith.mulf %402, %415 : vector<16x16xf32>
    %cst_140 = arith.constant 2.000000e+01 : f32
    %417 = vector.broadcast %cst_140 : f32 to vector<16x16xf32>
    %418 = arith.cmpf ogt, %416, %417 : vector<16x16xf32>
    %cst_141 = arith.constant 2.000000e+01 : f32
    %419 = vector.broadcast %cst_141 : f32 to vector<16x16xf32>
    %420 = arith.minimumf %416, %419 : vector<16x16xf32>
    %421 = math.exp %420 : vector<16x16xf32>
    %422 = math.log1p %421 : vector<16x16xf32>
    %423 = arith.select %418, %416, %422 : vector<16x16xi1>, vector<16x16xf32>
    %c0_142 = arith.constant 0 : index
    %c0_143 = arith.constant 0 : index
    %c0_144 = arith.constant 0 : index
    %424 = vector.load %arg5[%c0_142, %c0_143, %c0_144] : memref<1x16x16xf32, #tpu.memory_space<vmem>>, vector<1x16x16xf32>
    %425 = vector.shape_cast %424 : vector<1x16x16xf32> to vector<16x16xf32>
    %426 = vector.shape_cast %423 : vector<16x16xf32> to vector<1x16x16xf32>
    tpu.vector_store %arg5[%c0_142, %c0_143, %c0_144], %426 {strides = array<i32>} : memref<1x16x16xf32, #tpu.memory_space<vmem>>, vector<1x16x16xf32>,
    return
  }
  func.func @transform_0(%arg0: i32, %arg1: i32) -> (i32, i32, i32) {
    %c0_i32 = arith.constant 0 : i32
    %c0_i32_0 = arith.constant 0 : i32
    return %arg0, %arg1, %c0_i32 : i32, i32, i32
  }
  func.func @transform_1(%arg0: i32, %arg1: i32) -> (i32, i32, i32) {
    %c1_i32 = arith.constant 1 : i32
    %0 = arith.addi %arg1, %c1_i32 : i32
    %c2_i32 = arith.constant 2 : i32
    %1 = arith.muli %0, %c2_i32 : i32
    %c0_i32 = arith.constant 0 : i32
    %c0_i32_0 = arith.constant 0 : i32
    return %arg0, %1, %c0_i32 : i32, i32, i32
  }
  func.func @transform_2(%arg0: i32, %arg1: i32) -> i32 {
    %c0_i32 = arith.constant 0 : i32
    %c0_i32_0 = arith.constant 0 : i32
    return %c0_i32 : i32
  }
  func.func @transform_3(%arg0: i32, %arg1: i32) -> (i32, i32, i32) {
    %c0_i32 = arith.constant 0 : i32
    %c0_i32_0 = arith.constant 0 : i32
    return %arg0, %arg1, %c0_i32 : i32, i32, i32
  }
}

</mosaic_0001>

<bundles_post_ra>
// kernel: tpu_custom_call.1
= control target key start
LH: loop header
LB: loop body
LE: loop exit
PB: predicated region body
PF: predicated region fallthrough
CT: control target
= control target key end

     0   :  { %8 = vsyncpa [#allocation5], 0  ;;  %s3268_s0 = inlined_call_operand.vmem [shape: f32[2,24,16], index: 0, kind: input, shape index: {}]   ;;  %s3269_s1 = inlined_call_operand.vmem [shape: f32[2,24,16], index: 1, kind: input, shape index: {}]   ;;  %s3270_s2 = inlined_call_operand.vmem [shape: f32[77], index: 2, kind: input, shape index: {}]   ;;  %s3271_s3 = inlined_call_operand.hbm [shape: f32[2,16,16], index: 3, kind: output, shape index: {}]  }
   0x1   :  { %9 = vsyncpa [#allocation4], 0 }
   0x2   :  { %11 = vsyncpa [#allocation4 + $0x1], 0  ;;  %s2232_s12 = smov 0   ;;  %s2234_s13 = smov 0  }
   0x3   :  { %s2236_s14 = smov 0   ;;  %s2238_s15 = smov 0  }
   0x4   :  { %s2240_s16 = smov 0   ;;  %s2242_s17 = smov 0  }
   0x5 LB: > { %s1896_s18 = sadd.s32 4294967295, %s2199_s17   ;;  %s1897_s19 = sadd.s32 4294967294, %s2199_s17   ;;  %s2199_s17 = sphi %s2242_s17, %s17_s17   ;;  %s2195_s16 = sphi %s2240_s16, %s3325_s16   ;;  %s2191_s15 = sphi %s2238_s15, %s3324_s15   ;;  %s2187_s14 = sphi %s2236_s14, %s3323_s14   ;;  %s2183_s13 = sphi %s2234_s13, %s3322_s13   ;;  %s2179_s12 = sphi %s2232_s12, %s3321_s12  }
   0x6   : > { %s29_s20 = sadd.s32 1, %s2195_s16  ;;  %s119_s21 = sadd.s32 1, %s2187_s14 }
   0x7   : > { %p31_p0 = scmp.ge.s32.totalorder %s29_s20, 2  ;;  %p129_p1 = scmp.ne.s32.totalorder %s2187_s14, %s2183_s13 }
   0x8   : > { %p130_p2 = scmp.eq.s32.totalorder %s1896_s18, 1  ;;  %p135_p3 = scmp.ne.s32.totalorder %s2183_s13, %s2179_s12 }
   0x9   : > { %s3327_s20 = smov (%p31_p0, %s29_s20), 0  ;;  %p136_p5 = scmp.eq.s32.totalorder %s1897_s19, 1 }
   0xa   : > { %p2272_p4 = por %p130_p2, %p129_p1  ;;  %s114_s23 = ssub.s32 %s2195_s16, %s3327_s20 }
   0xb   : > { %p1898_p6 = scmp.ge.s32.totalorder %s2199_s17, 1  ;;  %p117_p7 = scmp.eq.s32.totalorder %s114_s23, 0 }
   0xc   : > { %p2279_p8 = por %p136_p5, %p135_p3  ;;  %p143_p9 = scmp.lt.s32.totalorder %s2199_s17, 3 }
   0xd   : > { %s2285_s25 = scalar_select %p117_p7, %s2187_s14, %s119_s21  }
   0xe   : > { %p2287_p10 = pnand %p1898_p6, %p143_p9  ;;  %p2291_p11 = scmp.eq.s32.totalorder %s1896_s18, 0 }
   0xf   : > { %s156_s30 = sshll.u32 %s3270_s2, 4  ;;  %s157_s30 = int_to_ptr.vmem [resolvable:$true] %s156_s30 }
  0x10   : > { %p1998_p12 = pneg %p2287_p10  ;;  %s2102_s4 = scalar_lea.vmem %s157_s30, 16 }
  0x11   : > { %p2103_p0 = scmp.ne.s32.totalorder %s157_s30, %s2102_s4  ;;  %p2110_p5 = scmp.lt.s32.totalorder %s157_s30, %s157_s30 }
  0x12   : > { %p1999_p13 = pnand %p2291_p11, %p1998_p12  ;;  %p2111_p6 = scmp.lt.s32.totalorder %s2102_s4, %s2102_s4 }
  0x14   : > { %p2104_p1 = pneg %p1999_p13  ;;  %p2112_p7 = por %p2111_p6, %p2110_p5 }
  0x16   : > { %p2105_p2 = pnand %p2104_p1, %p2103_p0 }
  0x18   : > { %p2106_p3 = pneg %p2105_p2 }
  0x1a   : > { %p2113_p9 = pnand %p2112_p7, %p2106_p3 }
  0x1c   : > { %2116 = shalt.err (!%p2113_p9)
}
  0x1d   : > { %s2201_s5 = smov [#allocation3]   ;;  %205 = sbr.rel (%p2287_p10) target bundleno = 1493 (0x5d5), region = 32 }
  0x1e   : > { %2001 = dma.vmem_to_smem (!%p1999_p13), %s157_s30, 16, %s2201_s5, [#allocation5]  }
  0x24   : > { %2170 = dma.done.wait (%p2291_p11), [#allocation5], 16  }
  0x25   : > { %2172 = vsyncadd (%p2291_p11), [#allocation5], 4294967280 }
  0x26   : > { %211 = sfence }
  0x27   : > { %p253_p12 = scmp.lt.s32.totalorder %s2191_s15, 1  ;;  %v2202_v0 = vmov 2   ;;  %s2203_s23 = smov 2   ;;  %vm289_vm0 = vcmask 146448   ;;  %v3272_v10 = vmov 17   ;;  %vm316_vm1 = vcmask 15360  }
  0x28   : > { %2068 = vset.pattern.permute.xlu1 %v2202_v0  ;;  %2069 = vset.pattern.permute.xlu0 %v2202_v0  ;;  %vm338_vm2 = vcmask 162960   ;;  %s1916_s26 = sld [smem:[#allocation3 + $0x1a]]  ;;  %s1920_s27 = sld [smem:[#allocation3 + $0x24]]  ;;  %vm1300_vm3 = vcmask 140304   ;;  %vm1286_vm4 = vcmask 142352   ;;  %vm1331_vm5 = vcmask 11264  }
  0x29   : > { %s254_s6 = scalar_select %p253_p12, %s2191_s15, 1  ;;  %vm1353_vm6 = vcmask 158864   ;;  %vm1713_vm11 = vcmask 1041408   ;;  %vm1765_vm13 = vcmask 130050  }
  0x2a   : > { %s1924_s28 = sld [smem:[#allocation3 + $0x2e]]  ;;  %s1918_s29 = sld [smem:[#allocation3 + $0x1f]] }
  0x2b   : > { %s1990_s7 = smul.u32 24, %s254_s6  ;;  %s2205_s30 = smov 127  }
  0x2c   : > { %s1926_s4 = sld [smem:[#allocation3 + $0x1b]]  ;;  %s1922_s5 = sld [smem:[#allocation3 + $0x29]] }
  0x2d   : > { %s260_s10 = scalar_lea.vmem %s3268_s0, %s1990_s7  ;;  %s1988_s11 = sadd.s32 16, %s1990_s7 }
  0x2e   : > { %v279_v1 = vld [vmem:[%s260_s10] sm:$0xff]  ;;  %s275_s21 = scalar_lea.vmem %s3269_s1, %s1988_s11  ;;  %v280_v3 = vld [vmem:[%s260_s10 + $0x8] sm:$0xff]  ;;  %v2330_v20 = vstv %s1916_s26  ;;  %v2337_v23 = vstv %s1920_s27  ;;  %s1908_s6 = sld [smem:[#allocation3 + $0x1e]] }
  0x2f   : > { %283 = vrot.lane.b32.xlu0 %v279_v1, %s2203_s23  ;;  %v292_v2 = vld [vmem:[%s275_s21] sm:$0xff]  ;;  %s1928_s7 = sld [smem:[#allocation3 + $0x20]]  ;;  %s1906_s8 = sld [smem:[#allocation3 + $0x19]] }
  0x30   : > { %294 = vrot.lane.b32.xlu1 %v292_v2, %s2203_s23  ;;  %v2347_v28 = vstv %s1924_s28  ;;  %v2354_v31 = vstv %s1918_s29  ;;  %s1910_s9 = sld [smem:[#allocation3 + $0x23]]  ;;  %s1932_s10 = sld [smem:[#allocation3 + $0x2a]] }
  0x31   : > { %s2362_s11 = sld [smem:[#allocation3 + $0x28]]  ;;  %s1930_s18 = sld [smem:[#allocation3 + $0x25]] }
  0x32   : > { %v2366_v35 = vstv %s1926_s4  ;;  %v2368_v36 = vstv %s1922_s5  ;;  %s2377_s19 = sld [smem:[#allocation3 + $0x2d]]  ;;  %s2381_s21 = sld [smem:[#allocation3 + $0x1c]] }
  0x33   : > { %285 = vrot.lane.b32.xlu0 %v280_v3, %s2203_s23  ;;  %s2383_s26 = sld [smem:[#allocation3 + $0x5]]  ;;  %s2206_s27 = smov 126  }
  0x34   : > { %v2375_v39 = vstv %s1908_s6  ;;  %s2388_s28 = sld [smem:[#allocation3 + $0x2f]]  ;;  %s2401_s29 = sld [smem:[#allocation3]] }
  0x35   : > { %v2379_v40 = vstv %s1928_s7  ;;  %v2397_v45 = vstv %s1906_s8  ;;  %s2403_s4 = sld [smem:[#allocation3 + $0xa]]  ;;  %s2407_s5 = sld [smem:[#allocation3 + $0x26]] }
  0x36   : > { %v2399_v46 = vstv %s1910_s9  ;;  %v2405_v47 = vstv %s1932_s10  ;;  %s2416_s6 = sld [smem:[#allocation3 + $0x15]]  ;;  %s2421_s7 = sld [smem:[#allocation3 + $0xf]] }
  0x37   : > { %v2419_v51 = vstv %s2362_s11  ;;  %v2423_v52 = vstv %s1930_s18  ;;  %s2432_s8 = sld [smem:[#allocation3 + $0x31]]  ;;  %s2437_s9 = sld [smem:[#allocation3 + $0x14]] }
  0x38   : > { %v2435_v57 = vstv %s2377_s19  ;;  %v2440_v58 = vstv %s2381_s21  ;;  %s2442_s10 = sld [smem:[#allocation3 + $0x1]]  ;;  %s2452_s11 = sld [smem:[#allocation3 + $0x16]] }
  0x39   : > { %v2447_v61 = vstv %s2383_s26  ;;  %s2457_s18 = sld [smem:[#allocation3 + $0x21]]  ;;  %s2207_s19 = smov 125  }
  0x3a   : > { %v2455_v63 = vstv %s2388_s28  ;;  %v2465_v3 = vstv %s2401_s29  ;;  %s2485_s21 = sld [smem:[#allocation3 + $0x17]]  ;;  %s2492_s26 = sld [smem:[#allocation3 + $0x2b]] }
  0x3b   : > { %s2499_s28 = sld [smem:[#allocation3 + $0x6]]  ;;  %s2510_s29 = sld [smem:[#allocation3 + $0x18]] }
  0xa1   : > { %v284_v4 = vpop.permute.xlu0 %283 }
  0xa2   : > { %290 = vst.msk [vmem:[#allocation2] sm:$0xff] %vm289_vm0, %v284_v4  ;;  %v295_v5 = vpop.permute.xlu1 %294  ;;  %v2468_v4 = vstv %s2403_s4  ;;  %s2529_s4 = sld [smem:[#allocation3 + $0x30]] }
  0xa3   : > { %297 = vst.msk [vmem:[#allocation2 + $0x10] sm:$0xff] %vm289_vm0, %v295_v5 }
  0xa5   : > { %v286_v6 = vpop.permute.xlu0 %285 }
  0xa6   : > { %291 = vst.msk [vmem:[#allocation2 + $0x8] sm:$0xff] %vm289_vm0, %v286_v6  ;;  %v2473_v6 = vstv %s2407_s5  ;;  %s2542_s5 = sld [smem:[#allocation3 + $0xb]] }
  0xa9   : > { %v298_v7 = vld [vmem:[#allocation2] sm:$0xff] }
  0xaa   : > { %303 = vperm.xlu1 %2068, %v298_v7   ;;  %v300_v8 = vld [vmem:[#allocation2 + $0x10] sm:$0xff] }
  0xad   : > { %v299_v9 = vld [vmem:[#allocation2 + $0x8] sm:$0xff] }
  0xae   : > { %313 = vperm.xlu1 %2068, %v300_v8   ;;  %308 = vperm.xlu0 %2069, %v299_v9  }
  0xb2   : > { %2070 = vset.pattern.permute.xlu1 %v3272_v10  ;;  %2071 = vset.pattern.permute.xlu0 %v3272_v10  ;;  %v2604_v10 = vstv %s2542_s5  ;;  %s1937_s5 = sld [smem:[#allocation3 + $0x8]] }
 0x129   : > { %v304_v11 = vpop.permute.xlu1 %303 }
 0x12a   : > { %317 = vst.msk [vmem:[#allocation2] sm:$0xff] %vm316_vm1, %v304_v11  ;;  %v2483_v11 = vstv %s2416_s6  ;;  %s1946_s6 = sld [smem:[#allocation3 + $0x1d]] }
 0x12d   : > { %v314_v12 = vpop.permute.xlu1 %313  ;;  %v309_v13 = vpop.permute.xlu0 %308 }
 0x12e   : > { %319 = vst.msk [vmem:[#allocation2 + $0x10] sm:$0xff] %vm316_vm1, %v314_v12  ;;  %318 = vst.msk [vmem:[#allocation2 + $0x8] sm:$0xff] %vm316_vm1, %v309_v13  ;;  %v2490_v13 = vstv %s2421_s7  ;;  %s1921_s7 = sld [smem:[#allocation3 + $0x10]] }
 0x131   : > { %v320_v14 = vld [vmem:[#allocation2] sm:$0xff] }
 0x132   : > { %325 = vperm.xlu1 %2070, %v320_v14  }
 0x135   : > { %v322_v15 = vld [vmem:[#allocation2 + $0x10] sm:$0xff]  ;;  %v321_v16 = vld [vmem:[#allocation2 + $0x8] sm:$0xff] }
 0x136   : > { %335 = vperm.xlu1 %2070, %v322_v15   ;;  %330 = vperm.xlu0 %2071, %v321_v16  }
 0x13a   : > { %2072 = vset.pattern.permute.xlu0 %v2202_v0  ;;  %2073 = vset.pattern.permute.xlu1 %v2202_v0 }
 0x1b1   : > { %v326_v17 = vpop.permute.xlu1 %325 }
 0x1b2   : > { %339 = vst.msk [vmem:[#allocation2] sm:$0xff] %vm338_vm2, %v326_v17  ;;  %v2502_v17 = vstv %s2432_s8  ;;  %s1948_s8 = sld [smem:[#allocation3 + $0x22]] }
 0x1b5   : > { %v336_v18 = vpop.permute.xlu1 %335  ;;  %v331_v19 = vpop.permute.xlu0 %330 }
 0x1b6   : > { %341 = vst.msk [vmem:[#allocation2 + $0x10] sm:$0xff] %vm338_vm2, %v336_v18  ;;  %340 = vst.msk [vmem:[#allocation2 + $0x8] sm:$0xff] %vm338_vm2, %v331_v19  ;;  %v2505_v18 = vstv %s2437_s9  ;;  %v2508_v19 = vstv %s2442_s10  ;;  %s1925_s9 = sld [smem:[#allocation3 + $0x2]]  ;;  %s1950_s10 = sld [smem:[#allocation3 + $0x27]] }
 0x1b9   : > { %v2332_v21 = vld [vmem:[#allocation2] sm:$0xff] }
 0x1ba   : > { %v459_v22 = vmul.f32 %v2330_v20, %v2332_v21  ;;  %v659_v50 = vmul.f32 %v2366_v35, %v2332_v21  ;;  %v859_v2 = vmul.f32 %v2440_v58, %v2332_v21 }
 0x1bc   : > { %465 = vrot.lane.b32.xlu1 %v459_v22, %s2205_s30 }
 0x1bd   : > { %v2339_v24 = vld [vmem:[#allocation2 + $0x2] sm:$0xff]  ;;  %v2392_v43 = vld [vmem:[#allocation2 + $0xa] sm:$0xff]  ;;  %v2487_v12 = vld [vmem:[#allocation2 + $0x14] sm:$0xf] }
 0x1be   : > { %v539_v25 = vmul.f32 %v2337_v23, %v2339_v24  ;;  %v2343_v26 = vld [vmem:[#allocation2 + $0x4] sm:$0xff]  ;;  %v394_v53 = vmul.f32 %v2399_v46, %v2392_v43  ;;  %v2427_v55 = vld [vmem:[#allocation2 + $0xc] sm:$0xff]  ;;  %v739_v62 = vmul.f32 %v2423_v52, %v2339_v24  ;;  %v386_v14 = vmul.f32 %v2468_v4, %v2392_v43 }
 0x1bf   : > { %v2345_v27 = vld [vmem:[#allocation2 + $0x8] sm:$0xff]  ;;  %v619_v32 = vmul.f32 %v2347_v28, %v2343_v26  ;;  %v432_v0 = vmul.f32 %v2435_v57, %v2427_v55  ;;  %v819_v9 = vmul.f32 %v2455_v63, %v2343_v26  ;;  %v939_v16 = vmul.f32 %v2473_v6, %v2339_v24 }
 0x1c0   : > { %545 = vrot.lane.b32.xlu1 %v539_v25, %s2205_s30  ;;  %v460_v29 = vmul.f32 %v2330_v20, %v2345_v27  ;;  %v2352_v30 = vld [vmem:[#allocation2 + $0x1] sm:$0xff]  ;;  %v2370_v37 = vld [vmem:[#allocation2 + $0x9] sm:$0xff]  ;;  %v660_v38 = vmul.f32 %v2366_v35, %v2345_v27  ;;  %v356_v48 = vmul.f32 %v2397_v45, %v2345_v27  ;;  %v348_v8 = vmul.f32 %v2465_v3, %v2345_v27 }
 0x1c1   : > { %v499_v33 = vmul.f32 %v2354_v31, %v2352_v30  ;;  %v2364_v34 = vld [vmem:[#allocation2 + $0x3] sm:$0xff]  ;;  %v375_v42 = vmul.f32 %v2375_v39, %v2370_v37  ;;  %v699_v44 = vmul.f32 %v2379_v40, %v2352_v30  ;;  %v2411_v49 = vld [vmem:[#allocation2 + $0xb] sm:$0xff]  ;;  %v367_v5 = vmul.f32 %v2447_v61, %v2370_v37 }
 0x1c2   : > { %467 = vrot.lane.b32.xlu0 %v460_v29, %s2205_s30  ;;  %v579_v41 = vmul.f32 %v2368_v36, %v2364_v34  ;;  %v779_v56 = vmul.f32 %v2405_v47, %v2364_v34  ;;  %v413_v59 = vmul.f32 %v2419_v51, %v2411_v49  ;;  %v405_v22 = vmul.f32 %v2490_v13, %v2411_v49 }
 0x1c3   : > { %v378_v54 = vadd.f32 %v375_v42, %v356_v48  ;;  %v370_v15 = vadd.f32 %v367_v5, %v348_v8  ;;  %v2516_v29 = vmul.f32 %v2483_v11, %v2487_v12  ;;  %v424_v42 = vmul.f32 %v2505_v18, %v2427_v55  ;;  %v2567_v8 = vld [vmem:[#allocation2 + $0x13] sm:$0xf] }
 0x1c4   : > { %625 = vrot.lane.b32.xlu1 %v619_v32, %s2205_s30  ;;  %v860_v32 = vmul.f32 %v2440_v58, %v2345_v27  ;;  %v2535_v48 = vmul.f32 %v2502_v17, %v2487_v12  ;;  %v433_v5 = vmul.f32 %v2435_v57, %v2487_v12 }
 0x1c5   : > { %v397_v60 = vadd.f32 %v394_v53, %v378_v54  ;;  %v389_v25 = vadd.f32 %v386_v14, %v370_v15  ;;  %v439_v53 = vmul.f32 %v2508_v19, %v2332_v21  ;;  %v2573_v14 = vstv %s2499_s28  ;;  %s1929_s28 = sld [smem:[#allocation3 + $0xc]] }
 0x1c6   : > { %505 = vrot.lane.b32.xlu0 %v499_v33, %s2205_s30  ;;  %v2522_v33 = vstv %s2452_s11  ;;  %3292 = vst [vmem:[#allocation11_spill] sm:$0xff] %v2535_v48  ;;  %v2576_v15 = vstv %s2510_s29  ;;  %v2622_v48 = vstv %s1921_s7  ;;  %s2208_s11 = smov 124   ;;  %s1935_s29 = sld [smem:[#allocation3 + $0x3]] }
 0x1c7   : > { %v416_v1 = vadd.f32 %v413_v59, %v397_v60  ;;  %3291 = vst [vmem:[#allocation10_spill] sm:$0xff] %v2522_v33  ;;  %v2550_v59 = vld [vmem:[#allocation2 + $0x12] sm:$0xf]  ;;  %s1945_s7 = sld [smem:[#allocation3 + $0x4]] }
 0x1c8   : > { %667 = vrot.lane.b32.xlu1 %v660_v38, %s2206_s27  ;;  %v2524_v38 = vld [vmem:[#allocation2 + $0x10] sm:$0xf] }
 0x1c9   : > { %v2475_v7 = vadd.f32 %v432_v0, %v416_v1  ;;  %v357_v0 = vmul.f32 %v2397_v45, %v2524_v38  ;;  %v2561_v1 = vstv %s2492_s26  ;;  %s1931_s26 = sld [smem:[#allocation3 + $0x11]] }
 0x1ca   : > { %585 = vrot.lane.b32.xlu0 %v579_v41, %s2205_s30  ;;  %v2527_v41 = vstv %s2457_s18  ;;  %s1952_s18 = sld [smem:[#allocation3 + $0x2c]] }
 0x1cb   : > { %3290 = vst [vmem:[#allocation9_spill] sm:$0xff] %v2475_v7  ;;  %v899_v60 = vmul.f32 %v2527_v41, %v2352_v30  ;;  %v387_v7 = vmul.f32 %v2468_v4, %v2550_v59 }
 0x1cc   : > { %705 = vrot.lane.b32.xlu1 %v699_v44, %s2206_s27  ;;  %v408_v44 = vadd.f32 %v405_v22, %v389_v25  ;;  %v395_v22 = vmul.f32 %v2399_v46, %v2550_v59 }
 0x1ce   : > { %665 = vrot.lane.b32.xlu0 %v659_v50, %s2206_s27  ;;  %v2537_v50 = vld [vmem:[#allocation2 + $0x11] sm:$0xf]  ;;  %v2544_v54 = vadd.f32 %v424_v42, %v408_v44  ;;  %v2588_v42 = vstv %s2529_s4  ;;  %s1939_s4 = sld [smem:[#allocation3 + $0xd]] }
 0x1d0   : > { %785 = vrot.lane.b32.xlu1 %v779_v56, %s2206_s27  ;;  %3293 = vst [vmem:[#allocation12_spill] sm:$0xff] %v2544_v54  ;;  %v2548_v56 = vmul.f32 %v2522_v33, %v2487_v12 }
 0x1d2   : > { %745 = vrot.lane.b32.xlu0 %v739_v62, %s2206_s27  ;;  %3294 = vst [vmem:[#allocation13_spill] sm:$0xff] %v2548_v56  ;;  %v2556_v62 = vstv %s2485_s21  ;;  %v406_v56 = vmul.f32 %v2490_v13, %v2567_v8  ;;  %s1927_s21 = sld [smem:[#allocation3 + $0x7]] }
 0x1d3   : > { %3295 = vst [vmem:[#allocation14_spill] sm:$0xff] %v2556_v62  ;;  %v2582_v25 = vmul.f32 %v2556_v62, %v2487_v12 }
 0x1d4   : > { %865 = vrot.lane.b32.xlu1 %v859_v2, %s2207_s19  ;;  %v376_v2 = vmul.f32 %v2375_v39, %v2537_v50 }
 0x1d5   : > { %3296 = vst [vmem:[#allocation15_spill] sm:$0xff] %v2582_v25 }
 0x1d6   : > { %825 = vrot.lane.b32.xlu0 %v819_v9, %s2206_s27  ;;  %v440_v9 = vmul.f32 %v2508_v19, %v2345_v27 }
 0x1d8   : > { %945 = vrot.lane.b32.xlu1 %v939_v16, %s2207_s19  ;;  %v379_v16 = vadd.f32 %v376_v2, %v357_v0  ;;  %v2597_v0 = vmul.f32 %v2576_v15, %v2487_v12  ;;  %v349_v2 = vmul.f32 %v2465_v3, %v2524_v38 }
 0x1da   : > { %867 = vrot.lane.b32.xlu0 %v860_v32, %s2207_s19  ;;  %v979_v32 = vmul.f32 %v2561_v1, %v2364_v34  ;;  %v398_v44 = vadd.f32 %v395_v22, %v379_v16  ;;  %3297 = vst [vmem:[#allocation16_spill] sm:$0xff] %v2597_v0  ;;  %v425_v22 = vmul.f32 %v2505_v18, %v2487_v12  ;;  %v2613_v0 = vstv %s1946_s6  ;;  %s1941_s6 = sld [smem:[#allocation3 + $0x12]] }
 0x1dc   : > { %445 = vrot.lane.b32.xlu1 %v439_v53, %s2205_s30  ;;  %v414_v53 = vmul.f32 %v2419_v51, %v2567_v8 }
 0x1de   : > { %905 = vrot.lane.b32.xlu0 %v899_v60, %s2207_s19  ;;  %v479_v60 = vmul.f32 %v2573_v14, %v2352_v30  ;;  %v417_v16 = vadd.f32 %v414_v53, %v398_v44  ;;  %v519_v44 = vmul.f32 %v2604_v10, %v2339_v24 }
 0x1e0   : > { %447 = vrot.lane.b32.xlu1 %v440_v9, %s2205_s30  ;;  %v368_v9 = vmul.f32 %v2447_v61, %v2537_v50  ;;  %v2615_v25 = vadd.f32 %v433_v5, %v417_v16  ;;  %v559_v5 = vmul.f32 %v2622_v48, %v2364_v34  ;;  %v2640_v16 = vstv %s1925_s9  ;;  %s1951_s9 = sld [smem:[#allocation3 + $0x13]] }
 0x1e2   : > { %985 = vrot.lane.b32.xlu0 %v979_v32, %s2207_s19  ;;  %v1019_v32 = vmul.f32 %v2588_v42, %v2343_v26  ;;  %v371_v54 = vadd.f32 %v368_v9, %v349_v2  ;;  %3298 = vst [vmem:[#allocation17_spill] sm:$0xff] %v2615_v25  ;;  %v2635_v9 = vstv %s1948_s8  ;;  %v2684_v25 = vstv %s1939_s4  ;;  %s1947_s8 = sld [smem:[#allocation3 + $0x9]] }
 0x1e3   : > { %3301 = vst [vmem:[#allocation20_spill] sm:$0xff] %v2684_v25  ;;  %s3057_s4 = sld [smem:[#allocation3 + $0x41]] }
 0x1e4   : > { %485 = vrot.lane.b32.xlu1 %v479_v60, %s2205_s30  ;;  %v390_v53 = vadd.f32 %v387_v7, %v371_v54  ;;  %v1059_v60 = vmul.f32 %v2613_v0, %v2332_v21  ;;  %v1060_v54 = vmul.f32 %v2613_v0, %v2345_v27 }
 0x1e6   : > { %1025 = vrot.lane.b32.xlu0 %v1019_v32, %s2207_s19  ;;  %v409_v2 = vadd.f32 %v406_v56, %v390_v53  ;;  %v599_v56 = vmul.f32 %v2483_v11, %v2343_v26  ;;  %v2645_v32 = vstv %s1950_s10  ;;  %s1949_s10 = sld [smem:[#allocation3 + $0xe]] }
 0x1e7   : > { %v1139_v53 = vmul.f32 %v2645_v32, %v2339_v24 }
 0x1e8   : > { %525 = vrot.lane.b32.xlu1 %v519_v44, %s2205_s30  ;;  %v2630_v7 = vadd.f32 %v425_v22, %v409_v2  ;;  %v1099_v22 = vmul.f32 %v2635_v9, %v2352_v30  ;;  %v639_v44 = vmul.f32 %v2640_v16, %v2332_v21  ;;  %v640_v2 = vmul.f32 %v2640_v16, %v2345_v27 }
 0x1ea   : > { %1065 = vrot.lane.b32.xlu0 %v1059_v60, %s2208_s11  ;;  %3299 = vst [vmem:[#allocation18_spill] sm:$0xff] %v2630_v7  ;;  %v2653_v60 = vstv %s1952_s18  ;;  %v2676_v7 = vstv %s1935_s29  ;;  %s1955_s18 = sld [smem:[#allocation3 + $0x4b]]  ;;  %s3054_s29 = sld [smem:[#allocation3 + $0x3c]] }
 0x1ec   : > { %565 = vrot.lane.b32.xlu1 %v559_v5, %s2205_s30  ;;  %v2658_v5 = vstv %s1927_s21  ;;  %s3048_s21 = sld [smem:[#allocation3 + $0x32]] }
 0x1ee   : > { %1067 = vrot.lane.b32.xlu0 %v1060_v54, %s2208_s11  ;;  %v1179_v54 = vmul.f32 %v2653_v60, %v2364_v34 }
 0x1f0   : > { %605 = vrot.lane.b32.xlu1 %v599_v56, %s2205_s30  ;;  %v679_v56 = vmul.f32 %v2658_v5, %v2352_v30 }
 0x1f2   : > { %1105 = vrot.lane.b32.xlu0 %v1099_v22, %s2208_s11  ;;  %v2666_v22 = vstv %s1931_s26  ;;  %s3050_s26 = sld [smem:[#allocation3 + $0x37]] }
 0x1f3   : > { %3300 = vst [vmem:[#allocation19_spill] sm:$0xff] %v2666_v22 }
 0x1f4   : > { %645 = vrot.lane.b32.xlu1 %v639_v44, %s2206_s27  ;;  %v1219_v44 = vmul.f32 %v2502_v17, %v2343_v26 }
 0x1f6   : > { %1145 = vrot.lane.b32.xlu0 %v1139_v53, %s2208_s11  ;;  %v2671_v53 = vstv %s1929_s28  ;;  %s3052_s28 = sld [smem:[#allocation3 + $0x38]] }
 0x1f8   : > { %647 = vrot.lane.b32.xlu1 %v640_v2, %s2206_s27  ;;  %v759_v2 = vmul.f32 %v2666_v22, %v2364_v34  ;;  %v2695_v22 = vstv %s1937_s5  ;;  %s3059_s5 = sld [smem:[#allocation3 + $0x3d]] }
 0x1f9   : > { %3302 = vst [vmem:[#allocation21_spill] sm:$0xff] %v2695_v22 }
 0x1fa   : > { %1185 = vrot.lane.b32.xlu0 %v1179_v54, %s2208_s11  ;;  %v719_v54 = vmul.f32 %v2671_v53, %v2339_v24 }
 0x1fc   : > { %685 = vrot.lane.b32.xlu1 %v679_v56, %s2206_s27  ;;  %v839_v56 = vmul.f32 %v2676_v7, %v2332_v21 }
 0x1fe   : > { %1225 = vrot.lane.b32.xlu0 %v1219_v44, %s2208_s11  ;;  %v799_v44 = vmul.f32 %v2522_v33, %v2343_v26  ;;  %v2705_v33 = vstv %s1945_s7  ;;  %s3063_s7 = sld [smem:[#allocation3 + $0x34]] }
 0x200   : > { %765 = vrot.lane.b32.xlu1 %v759_v2, %s2206_s27  ;;  %v919_v2 = vmul.f32 %v2684_v25, %v2339_v24  ;;  %v2703_v25 = vstv %s1941_s6  ;;  %s3061_s6 = sld [smem:[#allocation3 + $0x46]] }
 0x201   : > { %3303 = vst [vmem:[#allocation22_spill] sm:$0xff] %v2703_v25 }
 0x202   : > { %725 = vrot.lane.b32.xlu0 %v719_v54, %s2206_s27  ;;  %v840_v54 = vmul.f32 %v2676_v7, %v2345_v27 }
 0x204   : > { %845 = vrot.lane.b32.xlu1 %v839_v56, %s2207_s19  ;;  %v999_v56 = vmul.f32 %v2556_v62, %v2343_v26  ;;  %v959_v62 = vmul.f32 %v2703_v25, %v2364_v34 }
 0x206   : > { %805 = vrot.lane.b32.xlu0 %v799_v44, %s2206_s27  ;;  %v879_v44 = vmul.f32 %v2695_v22, %v2352_v30  ;;  %v2718_v22 = vstv %s1951_s9  ;;  %s3078_s9 = sld [smem:[#allocation3 + $0x35]] }
 0x207   : > { %3304 = vst [vmem:[#allocation23_spill] sm:$0xff] %v2718_v22  ;;  %v1159_v25 = vmul.f32 %v2718_v22, %v2364_v34  ;;  %v501_v22 = vmul.f32 %v2354_v31, %v2537_v50 }
 0x208   : > { %925 = vrot.lane.b32.xlu1 %v919_v2, %s2207_s19  ;;  %v1040_v2 = vmul.f32 %v2705_v33, %v2345_v27  ;;  %v2723_v27 = vstv %s1949_s10  ;;  %s3084_s10 = sld [smem:[#allocation3 + $0x47]] }
 0x20a   : > { %847 = vrot.lane.b32.xlu0 %v840_v54, %s2207_s19  ;;  %v2710_v54 = vstv %s1947_s8  ;;  %s3068_s8 = sld [smem:[#allocation3 + $0x42]] }
 0x20c   : > { %1005 = vrot.lane.b32.xlu1 %v999_v56, %s2207_s19  ;;  %v1079_v56 = vmul.f32 %v2710_v54, %v2352_v30 }
 0x20e   : > { %885 = vrot.lane.b32.xlu0 %v879_v44, %s2207_s19  ;;  %v1039_v44 = vmul.f32 %v2705_v33, %v2332_v21 }
 0x210   : > { %1047 = vrot.lane.b32.xlu1 %v1040_v2, %s2208_s11  ;;  %v461_v2 = vmul.f32 %v2330_v20, %v2524_v38  ;;  %v541_v20 = vmul.f32 %v2337_v23, %v2550_v59 }
 0x212   : > { %965 = vrot.lane.b32.xlu0 %v959_v62, %s2207_s19  ;;  %v1119_v62 = vmul.f32 %v2723_v27, %v2339_v24 }
 0x214   : > { %1085 = vrot.lane.b32.xlu1 %v1079_v56, %s2208_s11  ;;  %v1199_v56 = vmul.f32 %v2576_v15, %v2343_v26 }
 0x216   : > { %1045 = vrot.lane.b32.xlu0 %v1039_v44, %s2208_s11  ;;  %v500_v44 = vmul.f32 %v2354_v31, %v2370_v37  ;;  %v581_v31 = vmul.f32 %v2368_v36, %v2567_v8 }
 0x218   : > { %1165 = vrot.lane.b32.xlu1 %v1159_v25, %s2208_s11  ;;  %v540_v25 = vmul.f32 %v2337_v23, %v2392_v43  ;;  %v621_v23 = vmul.f32 %v2347_v28, %v2487_v12 }
 0x21a   : > { %1125 = vrot.lane.b32.xlu0 %v1119_v62, %s2208_s11  ;;  %v580_v62 = vmul.f32 %v2368_v36, %v2411_v49 }
 0x21c   : > { %469 = vrot.lane.b32.xlu1 %v461_v2, %s2205_s30  ;;  %v355_v2 = vmul.f32 %v2397_v45, %v2332_v21 }
 0x21e   : > { %1205 = vrot.lane.b32.xlu0 %v1199_v56, %s2208_s11  ;;  %v620_v56 = vmul.f32 %v2347_v28, %v2427_v55 }
 0x220   : > { %507 = vrot.lane.b32.xlu1 %v500_v44, %s2205_s30 }
 0x222   : > { %509 = vrot.lane.b32.xlu0 %v501_v22, %s2205_s30  ;;  %v374_v22 = vmul.f32 %v2375_v39, %v2352_v30  ;;  %v701_v39 = vmul.f32 %v2379_v40, %v2537_v50 }
 0x224   : > { %549 = vrot.lane.b32.xlu1 %v541_v20, %s2205_s30  ;;  %v377_v36 = vadd.f32 %v374_v22, %v355_v2  ;;  %v393_v20 = vmul.f32 %v2399_v46, %v2339_v24  ;;  %v700_v46 = vmul.f32 %v2379_v40, %v2370_v37  ;;  %v781_v2 = vmul.f32 %v2405_v47, %v2567_v8 }
 0x226   : > { %547 = vrot.lane.b32.xlu0 %v540_v25, %s2205_s30  ;;  %v661_v25 = vmul.f32 %v2366_v35, %v2524_v38  ;;  %v396_v45 = vadd.f32 %v393_v20, %v377_v36  ;;  %v820_v20 = vmul.f32 %v2455_v63, %v2427_v55 }
 0x228   : > { %587 = vrot.lane.b32.xlu1 %v580_v62, %s2205_s30  ;;  %v740_v62 = vmul.f32 %v2423_v52, %v2392_v43 }
 0x22a   : > { %589 = vrot.lane.b32.xlu0 %v581_v31, %s2205_s30  ;;  %v412_v31 = vmul.f32 %v2419_v51, %v2364_v34  ;;  %v741_v51 = vmul.f32 %v2423_v52, %v2550_v59 }
 0x22c   : > { %629 = vrot.lane.b32.xlu1 %v621_v23, %s2205_s30  ;;  %v415_v35 = vadd.f32 %v412_v31, %v396_v45  ;;  %v861_v31 = vmul.f32 %v2440_v58, %v2524_v38 }
 0x22e   : > { %v466_v44 = vpop.permute.xlu1 %465  ;;  %627 = vrot.lane.b32.xlu0 %v620_v56, %s2205_s30  ;;  %v431_v56 = vmul.f32 %v2435_v57, %v2343_v26 }
 0x230   : > { %709 = vrot.lane.b32.xlu1 %v701_v39, %s2206_s27  ;;  %v434_v39 = vadd.f32 %v431_v56, %v415_v35  ;;  %v821_v35 = vmul.f32 %v2455_v63, %v2487_v12  ;;  %v941_v63 = vmul.f32 %v2473_v6, %v2550_v59 }
 0x232   : > { %669 = vrot.lane.b32.xlu0 %v661_v25, %s2206_s27  ;;  %v546_v28 = vpop.permute.xlu1 %545  ;;  %v474_v25 = vadd.f32 %v466_v44, %v434_v39  ;;  %v940_v39 = vmul.f32 %v2473_v6, %v2392_v43 }
 0x234   : > { %v2778_v22 = vpop.permute.xlu0 %467  ;;  %747 = vrot.lane.b32.xlu1 %v740_v62, %s2206_s27  ;;  %v780_v62 = vmul.f32 %v2405_v47, %v2411_v49  ;;  %v900_v47 = vmul.f32 %v2527_v41, %v2370_v37 }
 0x236   : > { %707 = vrot.lane.b32.xlu0 %v700_v46, %s2206_s27  ;;  %v626_v23 = vpop.permute.xlu1 %625 }
 0x238   : > { %v506_v36 = vpop.permute.xlu0 %505  ;;  %789 = vrot.lane.b32.xlu1 %v781_v2, %s2206_s27 }
 0x239   : > { %v514_v57 = vadd.f32 %v506_v36, %v474_v25  ;;  %v901_v36 = vmul.f32 %v2527_v41, %v2537_v50  ;;  %v981_v41 = vmul.f32 %v2561_v1, %v2567_v8 }
 0x23a   : > { %749 = vrot.lane.b32.xlu0 %v741_v51, %s2206_s27  ;;  %v2792_v40 = vpop.permute.xlu1 %667 }
 0x23b   : > { %v554_v44 = vadd.f32 %v546_v28, %v514_v57 }
 0x23c   : > { %v586_v45 = vpop.permute.xlu0 %585  ;;  %827 = vrot.lane.b32.xlu1 %v820_v20, %s2206_s27 }
 0x23d   : > { %v594_v58 = vadd.f32 %v586_v45, %v554_v44 }
 0x23e   : > { %787 = vrot.lane.b32.xlu0 %v780_v62, %s2206_s27  ;;  %v706_v52 = vpop.permute.xlu1 %705  ;;  %v980_v62 = vmul.f32 %v2561_v1, %v2411_v49  ;;  %v480_v1 = vmul.f32 %v2573_v14, %v2370_v37 }
 0x23f   : > { %v634_v20 = vadd.f32 %v626_v23, %v594_v58  ;;  %v1021_v23 = vmul.f32 %v2588_v42, %v2487_v12  ;;  %v1061_v58 = vmul.f32 %v2613_v0, %v2524_v38  ;;  %v385_v0 = vmul.f32 %v2468_v4, %v2339_v24 }
 0x240   : > { %v666_v46 = vpop.permute.xlu0 %665  ;;  %869 = vrot.lane.b32.xlu1 %v861_v31, %s2207_s19  ;;  %v1100_v24 = vmul.f32 %v2635_v9, %v2370_v37 }
 0x241   : > { %v674_v57 = vadd.f32 %v666_v46, %v634_v20  ;;  %v481_v20 = vmul.f32 %v2573_v14, %v2537_v50 }
 0x242   : > { %829 = vrot.lane.b32.xlu0 %v821_v35, %s2206_s27  ;;  %v786_v2 = vpop.permute.xlu1 %785  ;;  %v441_v35 = vmul.f32 %v2508_v19, %v2524_v38  ;;  %v366_v19 = vmul.f32 %v2447_v61, %v2352_v30  ;;  %v520_v61 = vmul.f32 %v2604_v10, %v2392_v43 }
 0x243   : > { %v714_v44 = vadd.f32 %v706_v52, %v674_v57  ;;  %v404_v57 = vmul.f32 %v2490_v13, %v2364_v34  ;;  %v561_v13 = vmul.f32 %v2622_v48, %v2567_v8 }
 0x244   : > { %v746_v56 = vpop.permute.xlu0 %745  ;;  %907 = vrot.lane.b32.xlu1 %v900_v47, %s2207_s19 }
 0x245   : > { %v754_v12 = vadd.f32 %v746_v56, %v714_v44  ;;  %v423_v44 = vmul.f32 %v2505_v18, %v2343_v26  ;;  %v1140_v26 = vmul.f32 %v2645_v32, %v2392_v43 }
 0x246   : > { %909 = vrot.lane.b32.xlu0 %v901_v36, %s2207_s19  ;;  %v866_v51 = vpop.permute.xlu1 %865  ;;  %v1020_v36 = vmul.f32 %v2588_v42, %v2427_v55 }
 0x247   : > { %v794_v42 = vadd.f32 %v786_v2, %v754_v12 }
 0x248   : > { %v826_v28 = vpop.permute.xlu0 %825  ;;  %949 = vrot.lane.b32.xlu1 %v941_v63, %s2207_s19  ;;  %v347_v63 = vmul.f32 %v2465_v3, %v2332_v21  ;;  %v521_v21 = vmul.f32 %v2604_v10, %v2550_v59 }
 0x249   : > { %v834_v3 = vadd.f32 %v826_v28, %v794_v42 }
 0x24a   : > { %947 = vrot.lane.b32.xlu0 %v940_v39, %s2207_s19  ;;  %v946_v25 = vpop.permute.xlu1 %945  ;;  %v369_v56 = vadd.f32 %v366_v19, %v347_v63 }
 0x24b   : > { %v874_v4 = vadd.f32 %v866_v51, %v834_v3 }
 0x24c   : > { %v2820_v45 = vpop.permute.xlu0 %867  ;;  %989 = vrot.lane.b32.xlu1 %v981_v41, %s2207_s19  ;;  %v388_v14 = vadd.f32 %v385_v0, %v369_v56 }
 0x24e   : > { %987 = vrot.lane.b32.xlu0 %v980_v62, %s2207_s19  ;;  %v446_v6 = vpop.permute.xlu1 %445  ;;  %v1101_v62 = vmul.f32 %v2635_v9, %v2537_v50  ;;  %v407_v10 = vadd.f32 %v404_v57, %v388_v14  ;;  %v641_v14 = vmul.f32 %v2640_v16, %v2524_v38  ;;  %v681_v57 = vmul.f32 %v2658_v5, %v2537_v50 }
 0x250   : > { %v906_v31 = vpop.permute.xlu0 %905  ;;  %1029 = vrot.lane.b32.xlu1 %v1021_v23, %s2207_s19  ;;  %v426_v9 = vadd.f32 %v423_v44, %v407_v10  ;;  %v2902_v10 = vstv %s1955_s18  ;;  %v720_v44 = vmul.f32 %v2671_v53, %v2392_v43  ;;  %s3095_s18 = sld [smem:[#allocation3 + $0x36]] }
 0x252   : > { %449 = vrot.lane.b32.xlu0 %v441_v35, %s2205_s30  ;;  %v2832_v47 = vpop.permute.xlu1 %447  ;;  %v560_v35 = vmul.f32 %v2622_v48, %v2411_v49  ;;  %v454_v12 = vadd.f32 %v446_v6, %v426_v9  ;;  %v680_v9 = vmul.f32 %v2658_v5, %v2370_v37 }
 0x254   : > { %v986_v46 = vpop.permute.xlu0 %985  ;;  %487 = vrot.lane.b32.xlu1 %v480_v1, %s2205_s30  ;;  %v914_v1 = vadd.f32 %v906_v31, %v874_v4  ;;  %v600_v31 = vmul.f32 %v2483_v11, %v2427_v55  ;;  %v1180_v11 = vmul.f32 %v2653_v60, %v2411_v49 }
 0x256   : > { %1027 = vrot.lane.b32.xlu0 %v1020_v36, %s2207_s19  ;;  %v486_v52 = vpop.permute.xlu1 %485  ;;  %v1141_v36 = vmul.f32 %v2645_v32, %v2550_v59  ;;  %v954_v19 = vadd.f32 %v946_v25, %v914_v1 }
 0x257   : > { %v494_v18 = vadd.f32 %v486_v52, %v454_v12  ;;  %v1181_v52 = vmul.f32 %v2653_v60, %v2567_v8 }
 0x258   : > { %v1026_v39 = vpop.permute.xlu0 %1025  ;;  %1069 = vrot.lane.b32.xlu1 %v1061_v58, %s2208_s11  ;;  %v994_v63 = vadd.f32 %v986_v46, %v954_v19 }
 0x25a   : > { %489 = vrot.lane.b32.xlu0 %v481_v20, %s2205_s30  ;;  %v526_v30 = vpop.permute.xlu1 %525  ;;  %v1034_v25 = vadd.f32 %v1026_v39, %v994_v63 }
 0x25b   : > { %v534_v20 = vadd.f32 %v526_v30, %v494_v18 }
 0x25c   : > { %v1066_v41 = vpop.permute.xlu0 %1065  ;;  %527 = vrot.lane.b32.xlu1 %v520_v61, %s2205_s30 }
 0x25d   : > { %v1074_v56 = vadd.f32 %v1066_v41, %v1034_v25  ;;  %v3305_v41 = vld [vmem:[#allocation11_spill] sm:$0xff] }
 0x25e   : > { %529 = vrot.lane.b32.xlu0 %v521_v21, %s2205_s30  ;;  %v566_v2 = vpop.permute.xlu1 %565 }
 0x25f   : > { %v574_v6 = vadd.f32 %v566_v2, %v534_v20 }
 0x260   : > { %v2862_v23 = vpop.permute.xlu0 %1067  ;;  %1109 = vrot.lane.b32.xlu1 %v1101_v62, %s2208_s11 }
 0x262   : > { %1107 = vrot.lane.b32.xlu0 %v1100_v24, %s2208_s11  ;;  %v606_v28 = vpop.permute.xlu1 %605 }
 0x263   : > { %v614_v61 = vadd.f32 %v606_v28, %v574_v6  ;;  %v841_v6 = vmul.f32 %v2676_v7, %v2524_v38 }
 0x264   : > { %v1106_v34 = vpop.permute.xlu0 %1105  ;;  %567 = vrot.lane.b32.xlu1 %v560_v35, %s2205_s30  ;;  %v1220_v35 = vmul.f32 %v2502_v17, %v2427_v55 }
 0x265   : > { %v1114_v46 = vadd.f32 %v1106_v34, %v1074_v56  ;;  %v3308_v56 = vld [vmem:[#allocation13_spill] sm:$0xff] }
 0x266   : > { %569 = vrot.lane.b32.xlu0 %v561_v13, %s2205_s30  ;;  %v646_v51 = vpop.permute.xlu1 %645 }
 0x267   : > { %v654_v30 = vadd.f32 %v646_v51, %v614_v61  ;;  %v3306_v51 = vld [vmem:[#allocation19_spill] sm:$0xff] }
 0x268   : > { %v1146_v58 = vpop.permute.xlu0 %1145  ;;  %1149 = vrot.lane.b32.xlu1 %v1141_v36, %s2208_s11  ;;  %v761_v36 = vmul.f32 %v3306_v51, %v2567_v8 }
 0x269   : > { %v1154_v21 = vadd.f32 %v1146_v58, %v1114_v46 }
 0x26a   : > { %1147 = vrot.lane.b32.xlu0 %v1140_v26, %s2208_s11  ;;  %v2882_v48 = vpop.permute.xlu1 %647  ;;  %v721_v26 = vmul.f32 %v2671_v53, %v2550_v59 }
 0x26c   : > { %v1186_v42 = vpop.permute.xlu0 %1185  ;;  %607 = vrot.lane.b32.xlu1 %v600_v31, %s2205_s30  ;;  %v3307_v31 = vld [vmem:[#allocation10_spill] sm:$0xff] }
 0x26d   : > { %v1194_v2 = vadd.f32 %v1186_v42, %v1154_v21  ;;  %v800_v63 = vmul.f32 %v3307_v31, %v2427_v55  ;;  %v760_v42 = vmul.f32 %v3306_v51, %v2411_v49  ;;  %v3313_v51 = vld [vmem:[#allocation15_spill] sm:$0xff]  ;;  %v1041_v31 = vmul.f32 %v2705_v33, %v2524_v38 }
 0x26e   : > { %609 = vrot.lane.b32.xlu0 %v2516_v29, %s2205_s30  ;;  %v686_v32 = vpop.permute.xlu1 %685  ;;  %v3314_v38 = vld [vmem:[#allocation23_spill] sm:$0xff] }
 0x26f   : > { %v694_v29 = vadd.f32 %v686_v32, %v654_v30 }
 0x270   : > { %v1226_v0 = vpop.permute.xlu0 %1225  ;;  %1189 = vrot.lane.b32.xlu1 %v1181_v52, %s2208_s11 }
 0x271   : > { %v1234_v24 = vadd.f32 %v1226_v0, %v1194_v2  ;;  %v3309_v0 = vld [vmem:[#allocation21_spill] sm:$0xff] }
 0x272   : > { %1187 = vrot.lane.b32.xlu0 %v1180_v11, %s2208_s11  ;;  %v766_v39 = vpop.permute.xlu1 %765  ;;  %v880_v11 = vmul.f32 %v3309_v0, %v2370_v37  ;;  %v881_v30 = vmul.f32 %v3309_v0, %v2537_v50 }
 0x273   : > { %v1239_v1 = vmul.f32 %v2902_v10, %v1234_v24 }
 0x274   : > { %v726_v3 = vpop.permute.xlu0 %725  ;;  %1229 = vrot.lane.b32.xlu1 %v3305_v41, %s2208_s11 }
 0x275   : > { %v734_v62 = vadd.f32 %v726_v3, %v694_v29  ;;  %v1242_v12 = vadd.f32 1.0, %v1239_v1  ;;  %v3310_v29 = vld [vmem:[#allocation20_spill] sm:$0xff] }
 0x276   : > { %649 = vrot.lane.b32.xlu0 %v641_v14, %s2206_s27  ;;  %v846_v60 = vpop.permute.xlu1 %845  ;;  %v921_v3 = vmul.f32 %v3310_v29, %v2550_v59  ;;  %v920_v2 = vmul.f32 %v3310_v29, %v2392_v43 }
 0x277   : > { %v774_v4 = vadd.f32 %v766_v39, %v734_v62  ;;  %2076 = vrcp.f32 %v1242_v12 }
 0x278   : > { %v806_v28 = vpop.permute.xlu0 %805  ;;  %689 = vrot.lane.b32.xlu1 %v681_v57, %s2206_s27  ;;  %v3311_v57 = vld [vmem:[#allocation22_spill] sm:$0xff] }
 0x279   : > { %v814_v34 = vadd.f32 %v806_v28, %v774_v4  ;;  %v960_v24 = vmul.f32 %v3311_v57, %v2411_v49 }
 0x27a   : > { %1227 = vrot.lane.b32.xlu0 %v1220_v35, %s2208_s11  ;;  %v926_v16 = vpop.permute.xlu1 %925  ;;  %v961_v35 = vmul.f32 %v3311_v57, %v2567_v8 }
 0x27b   : > { %v854_v19 = vadd.f32 %v846_v60, %v814_v34 }
 0x27c   : > { %v2911_v13 = vpop.permute.xlu0 %847  ;;  %727 = vrot.lane.b32.xlu1 %v720_v44, %s2206_s27 }
 0x27e   : > { %687 = vrot.lane.b32.xlu0 %v680_v9, %s2206_s27  ;;  %v1006_v17 = vpop.permute.xlu1 %1005  ;;  %v3312_v9 = vld [vmem:[#allocation14_spill] sm:$0xff] }
 0x280   : > { %v886_v58 = vpop.permute.xlu0 %885  ;;  %769 = vrot.lane.b32.xlu1 %v761_v36, %s2206_s27 }
 0x281   : > { %v894_v18 = vadd.f32 %v886_v58, %v854_v19  ;;  %v2077_v39 = vpop.eup %2076  ;;  %v1081_v58 = vmul.f32 %v2710_v54, %v2537_v50 }
 0x282   : > { %729 = vrot.lane.b32.xlu0 %v721_v26, %s2206_s27  ;;  %v2923_v5 = vpop.permute.xlu1 %1047  ;;  %v1248_v14 = vmul.f32 %v2077_v39, %v1242_v12 }
 0x283   : > { %v934_v25 = vadd.f32 %v926_v16, %v894_v18 }
 0x284   : > { %v966_v20 = vpop.permute.xlu0 %965  ;;  %807 = vrot.lane.b32.xlu1 %v800_v63, %s2206_s27  ;;  %v1251_v4 = vsub.f32 2.0, %v1248_v14 }
 0x285   : > { %v974_v52 = vadd.f32 %v966_v20, %v934_v25 }
 0x286   : > { %767 = vrot.lane.b32.xlu0 %v760_v42, %s2206_s27  ;;  %v1086_v53 = vpop.permute.xlu1 %1085  ;;  %v1254_v1 = vmul.f32 %v2077_v39, %v1251_v4  ;;  %v1120_v42 = vmul.f32 %v2723_v27, %v2392_v43  ;;  %v1121_v43 = vmul.f32 %v2723_v27, %v2550_v59 }
 0x287   : > { %v1014_v21 = vadd.f32 %v1006_v17, %v974_v52  ;;  %v1000_v17 = vmul.f32 %v3312_v9, %v2427_v55  ;;  %v3317_v9 = vld [vmem:[#allocation17_spill] sm:$0xff] }
 0x288   : > { %v1046_v32 = vpop.permute.xlu0 %1045  ;;  %849 = vrot.lane.b32.xlu1 %v841_v6, %s2207_s19  ;;  %v1257_v26 = vmul.f32 %v1254_v1, %v1242_v12  ;;  %v1080_v6 = vmul.f32 %v2710_v54, %v2370_v37  ;;  %v1161_v12 = vmul.f32 %v3314_v38, %v2567_v8  ;;  %v1200_v54 = vmul.f32 %v2576_v15, %v2427_v55  ;;  %v3315_v55 = vld [vmem:[#allocation16_spill] sm:$0xff] }
 0x289   : > { %v1054_v62 = vadd.f32 %v1046_v32, %v1014_v21  ;;  %v1292_v32 = vlaneseq  ;;  %v1160_v8 = vmul.f32 %v3314_v38, %v2411_v49 }
 0x28a   : > { %809 = vrot.lane.b32.xlu0 %v3308_v56, %s2206_s27  ;;  %v1166_v61 = vpop.permute.xlu1 %1165  ;;  %v1260_v25 = vsub.f32 2.0, %v1257_v26 }
 0x28b   : > { %v1094_v16 = vadd.f32 %v1086_v53, %v1054_v62  ;;  %v2989_v0 = vshrl.u32 %v1292_v32, 7 }
 0x28c   : > { %v1126_v46 = vpop.permute.xlu0 %1125  ;;  %887 = vrot.lane.b32.xlu1 %v880_v11, %s2207_s19  ;;  %v1263_v52 = vmul.f32 %v1260_v25, %v1254_v1 }
 0x28d   : > { %v1134_v36 = vadd.f32 %v1126_v46, %v1094_v16  ;;  %v1294_v46 = vsub.s32 2, %v2989_v0 }
 0x28e   : > { %889 = vrot.lane.b32.xlu0 %v881_v30, %s2207_s19  ;;  %v2942_v7 = vpop.permute.xlu1 %469 }
 0x28f   : > { %v1174_v63 = vadd.f32 %v1166_v61, %v1134_v36 }
 0x290   : > { %v1206_v41 = vpop.permute.xlu0 %1205  ;;  %929 = vrot.lane.b32.xlu1 %v921_v3, %s2207_s19 }
 0x291   : > { %v1214_v50 = vadd.f32 %v1206_v41, %v1174_v63 }
 0x292   : > { %927 = vrot.lane.b32.xlu0 %v920_v2, %s2207_s19  ;;  %v2950_v60 = vpop.permute.xlu1 %507 }
 0x293   : > { %v2984_v61 = vmul.f32 %v1263_v52, %v1214_v50 }
 0x294   : > { %v2954_v28 = vpop.permute.xlu0 %509  ;;  %967 = vrot.lane.b32.xlu1 %v960_v24, %s2207_s19  ;;  %v3316_v24 = vld [vmem:[#allocation9_spill] sm:$0xff] }
 0x295   : > { %v1269_v59 = vmul.f32 %v2984_v61, %v2984_v61  ;;  %v475_v4 = vadd.f32 %v2778_v22, %v3316_v24 }
 0x296   : > { %969 = vrot.lane.b32.xlu0 %v961_v35, %s2207_s19  ;;  %v2960_v44 = vpop.permute.xlu1 %549 }
 0x297   : > { %v1295_v39 = vrot.slane %v1269_v59, %v1294_v46  ;;  %v515_v16 = vadd.f32 %v2950_v60, %v475_v4 }
 0x298   : > { %v548_v34 = vpop.permute.xlu0 %547  ;;  %1009 = vrot.lane.b32.xlu1 %v3313_v51, %s2207_s19 }
 0x299   : > { %v555_v51 = vadd.f32 %v548_v34, %v515_v16 }
 0x29a   : > { %1007 = vrot.lane.b32.xlu0 %v1000_v17, %s2207_s19  ;;  %v588_v19 = vpop.permute.xlu1 %587  ;;  %v476_v17 = vadd.f32 %v2942_v7, %v3317_v9 }
 0x29b   : > { %v595_v26 = vadd.f32 %v588_v19, %v555_v51 }
 0x29c   : > { %v590_v18 = vpop.permute.xlu0 %589  ;;  %1089 = vrot.lane.b32.xlu1 %v1081_v58, %s2208_s11  ;;  %v516_v58 = vadd.f32 %v2954_v28, %v476_v17 }
 0x29e   : > { %1049 = vrot.lane.b32.xlu0 %v1041_v31, %s2208_s11  ;;  %v630_v20 = vpop.permute.xlu1 %629  ;;  %v556_v63 = vadd.f32 %v2960_v44, %v516_v58 }
 0x2a0   : > { %v628_v53 = vpop.permute.xlu0 %627  ;;  %1127 = vrot.lane.b32.xlu1 %v1120_v42, %s2208_s11 }
 0x2a1   : > { %v635_v42 = vadd.f32 %v628_v53, %v595_v26 }
 0x2a2   : > { %1087 = vrot.lane.b32.xlu0 %v1080_v6, %s2208_s11  ;;  %v710_v33 = vpop.permute.xlu1 %709  ;;  %v596_v6 = vadd.f32 %v590_v18, %v556_v63 }
 0x2a3   : > { %v675_v38 = vadd.f32 %v2792_v40, %v635_v42 }
 0x2a4   : > { %v670_v56 = vpop.permute.xlu0 %669  ;;  %1169 = vrot.lane.b32.xlu1 %v1161_v12, %s2208_s11  ;;  %v636_v22 = vadd.f32 %v630_v20, %v596_v6  ;;  %v3319_v6 = vld [vmem:[#allocation18_spill] sm:$0xff] }
 0x2a6   : > { %1129 = vrot.lane.b32.xlu0 %v1121_v43, %s2208_s11  ;;  %v748_v37 = vpop.permute.xlu1 %747  ;;  %v676_v12 = vadd.f32 %v670_v56, %v636_v22 }
 0x2a8   : > { %v708_v11 = vpop.permute.xlu0 %707  ;;  %1207 = vrot.lane.b32.xlu1 %v1200_v54, %s2208_s11  ;;  %v716_v34 = vadd.f32 %v710_v33, %v676_v12 }
 0x2a9   : > { %v715_v32 = vadd.f32 %v708_v11, %v675_v38 }
 0x2aa   : > { %1167 = vrot.lane.b32.xlu0 %v1160_v8, %s2208_s11  ;;  %v790_v27 = vpop.permute.xlu1 %789 }
 0x2ab   : > { %v755_v43 = vadd.f32 %v748_v37, %v715_v32 }
 0x2ac   : > { %v750_v30 = vpop.permute.xlu0 %749  ;;  %1275 = vrot.lane.b32.xlu1 %v1269_v59, %s2203_s23 }
 0x2ad   : > { %v756_v28 = vadd.f32 %v750_v30, %v716_v34 }
 0x2ae   : > { %1209 = vrot.lane.b32.xlu0 %v3315_v55, %s2208_s11  ;;  %v828_v15 = vpop.permute.xlu1 %827 }
 0x2af   : > { %v796_v44 = vadd.f32 %v790_v27, %v756_v28 }
 0x2b0   : > { %v788_v21 = vpop.permute.xlu0 %787  ;;  %1297 = vrot.lane.b32.xlu1 %v1295_v39, %s2203_s23 }
 0x2b1   : > { %v795_v19 = vadd.f32 %v788_v21, %v755_v43 }
 0x2b2   : > { %v870_v49 = vpop.permute.xlu1 %869 }
 0x2b3   : > { %v835_v53 = vadd.f32 %v828_v15, %v795_v19 }
 0x2b4   : > { %v830_v29 = vpop.permute.xlu0 %829 }
 0x2b5   : > { %v836_v18 = vadd.f32 %v830_v29, %v796_v44  ;;  %v875_v20 = vadd.f32 %v2820_v45, %v835_v53 }
 0x2b6   : > { %v908_v3 = vpop.permute.xlu1 %907 }
 0x2b7   : > { %v876_v39 = vadd.f32 %v870_v49, %v836_v18  ;;  %v915_v56 = vadd.f32 %v908_v3, %v875_v20  ;;  %v3318_v49 = vld [vmem:[#allocation12_spill] sm:$0xff] }
 0x2b8   : > { %v910_v14 = vpop.permute.xlu0 %909  ;;  %v455_v3 = vadd.f32 %v2832_v47, %v3318_v49 }
 0x2b9   : > { %v916_v33 = vadd.f32 %v910_v14, %v876_v39 }
 0x2ba   : > { %v950_v41 = vpop.permute.xlu1 %949 }
 0x2bb   : > { %v956_v30 = vadd.f32 %v950_v41, %v916_v33 }
 0x2bc   : > { %v948_v2 = vpop.permute.xlu0 %947 }
 0x2bd   : > { %v955_v24 = vadd.f32 %v948_v2, %v915_v56 }
 0x2be   : > { %v990_v62 = vpop.permute.xlu1 %989 }
 0x2bf   : > { %v996_v17 = vadd.f32 %v990_v62, %v956_v30 }
 0x2c0   : > { %v988_v57 = vpop.permute.xlu0 %987 }
 0x2c1   : > { %v995_v37 = vadd.f32 %v988_v57, %v955_v24 }
 0x2c2   : > { %v1030_v35 = vpop.permute.xlu1 %1029 }
 0x2c3   : > { %v1036_v15 = vadd.f32 %v1030_v35, %v996_v17 }
 0x2c4   : > { %v450_v1 = vpop.permute.xlu0 %449 }
 0x2c5   : > { %v456_v62 = vadd.f32 %v450_v1, %v3319_v6 }
 0x2c6   : > { %v488_v36 = vpop.permute.xlu1 %487 }
 0x2c7   : > { %v495_v57 = vadd.f32 %v488_v36, %v455_v3 }
 0x2c8   : > { %v1028_v31 = vpop.permute.xlu0 %1027 }
 0x2c9   : > { %v1035_v21 = vadd.f32 %v1028_v31, %v995_v37 }
 0x2ca   : > { %v1070_v25 = vpop.permute.xlu1 %1069 }
 0x2cb   : > { %v1075_v29 = vadd.f32 %v2862_v23, %v1035_v21  ;;  %v1076_v58 = vadd.f32 %v1070_v25, %v1036_v15 }
 0x2cc   : > { %v490_v50 = vpop.permute.xlu0 %489 }
 0x2cd   : > { %v496_v12 = vadd.f32 %v490_v50, %v456_v62 }
 0x2ce   : > { %v528_v60 = vpop.permute.xlu1 %527 }
 0x2cf   : > { %v535_v22 = vadd.f32 %v528_v60, %v495_v57 }
 0x2d0   : > { %v530_v52 = vpop.permute.xlu0 %529 }
 0x2d1   : > { %v536_v43 = vadd.f32 %v530_v52, %v496_v12 }
 0x2d2   : > { %v1110_v7 = vpop.permute.xlu1 %1109 }
 0x2d3   : > { %v1116_v2 = vadd.f32 %v1110_v7, %v1076_v58 }
 0x2d4   : > { %v1108_v54 = vpop.permute.xlu0 %1107 }
 0x2d5   : > { %v1115_v45 = vadd.f32 %v1108_v54, %v1075_v29 }
 0x2d6   : > { %v568_v8 = vpop.permute.xlu1 %567 }
 0x2d7   : > { %v575_v25 = vadd.f32 %v568_v8, %v535_v22 }
 0x2d8   : > { %v570_v59 = vpop.permute.xlu0 %569 }
 0x2d9   : > { %v576_v28 = vadd.f32 %v570_v59, %v536_v43 }
 0x2da   : > { %v1150_v46 = vpop.permute.xlu1 %1149 }
 0x2db   : > { %v1156_v42 = vadd.f32 %v1150_v46, %v1116_v2 }
 0x2dc   : > { %v1148_v55 = vpop.permute.xlu0 %1147 }
 0x2dd   : > { %v1155_v63 = vadd.f32 %v1148_v55, %v1115_v45 }
 0x2de   : > { %v608_v40 = vpop.permute.xlu1 %607 }
 0x2df   : > { %v615_v54 = vadd.f32 %v608_v40, %v575_v25 }
 0x2e0   : > { %v610_v11 = vpop.permute.xlu0 %609 }
 0x2e1   : > { %v616_v44 = vadd.f32 %v610_v11, %v576_v28  ;;  %v655_v1 = vadd.f32 %v2882_v48, %v615_v54 }
 0x2e2   : > { %v1190_v4 = vpop.permute.xlu1 %1189 }
 0x2e3   : > { %v1196_v35 = vadd.f32 %v1190_v4, %v1156_v42 }
 0x2e4   : > { %v1188_v16 = vpop.permute.xlu0 %1187 }
 0x2e5   : > { %v1195_v41 = vadd.f32 %v1188_v16, %v1155_v63 }
 0x2e6   : > { %v1230_v9 = vpop.permute.xlu1 %1229 }
 0x2e7   : > { %v1236_v32 = vadd.f32 %v1230_v9, %v1196_v35 }
 0x2e8   : > { %v650_v27 = vpop.permute.xlu0 %649 }
 0x2e9   : > { %v1241_v36 = vmul.f32 %v2902_v10, %v1236_v32  ;;  %v656_v46 = vadd.f32 %v650_v27, %v616_v44 }
 0x2ea   : > { %v690_v51 = vpop.permute.xlu1 %689 }
 0x2eb   : > { %v1244_v50 = vadd.f32 1.0, %v1241_v36  ;;  %v696_v55 = vadd.f32 %v690_v51, %v656_v46 }
 0x2ec   : > { %v1228_v26 = vpop.permute.xlu0 %1227 }
 0x2ed   : > { %v1235_v38 = vadd.f32 %v1228_v26, %v1195_v41 }
 0x2ee   : > { %v728_v14 = vpop.permute.xlu1 %727 }
 0x2ef   : > { %v1240_v47 = vmul.f32 %v2902_v10, %v1235_v38 }
 0x2f0   : > { %v688_v31 = vpop.permute.xlu0 %687 }
 0x2f1   : > { %v1243_v60 = vadd.f32 1.0, %v1240_v47  ;;  %v695_v18 = vadd.f32 %v688_v31, %v655_v1 }
 0x2f2   : > { %v770_v23 = vpop.permute.xlu1 %769 }
 0x2f3   : > { %2078 = vrcp.f32 %v1243_v60  ;;  %v735_v20 = vadd.f32 %v728_v14, %v695_v18 }
 0x2f4   : > { %v730_v34 = vpop.permute.xlu0 %729  ;;  %2080 = vrcp.f32 %v1244_v50 }
 0x2f5   : > { %v736_v40 = vadd.f32 %v730_v34, %v696_v55  ;;  %v1304_v55 = vsub.s32 1, %v2989_v0 }
 0x2f6   : > { %v808_v7 = vpop.permute.xlu1 %807 }
 0x2f7   : > { %v776_v10 = vadd.f32 %v770_v23, %v736_v40 }
 0x2f8   : > { %v768_v19 = vpop.permute.xlu0 %767 }
 0x2f9   : > { %v775_v59 = vadd.f32 %v768_v19, %v735_v20 }
 0x2fa   : > { %v850_v53 = vpop.permute.xlu1 %849 }
 0x2fb   : > { %v815_v11 = vadd.f32 %v808_v7, %v775_v59  ;;  %v3320_v59 = vmov 17  }
 0x2fc   : > { %v810_v8 = vpop.permute.xlu0 %809 }
 0x2fd   : > { %v816_v4 = vadd.f32 %v810_v8, %v776_v10  ;;  %v2079_v33 = vpop.eup %2078  ;;  %v855_v30 = vadd.f32 %v2911_v13, %v815_v11 }
 0x2fe   : > { %v888_v52 = vpop.permute.xlu1 %887  ;;  %v2081_v21 = vpop.eup %2080  ;;  %v1249_v17 = vmul.f32 %v2079_v33, %v1243_v60 }
 0x2ff   : > { %v856_v16 = vadd.f32 %v850_v53, %v816_v4  ;;  %v895_v27 = vadd.f32 %v888_v52, %v855_v30  ;;  %v1250_v29 = vmul.f32 %v2081_v21, %v1244_v50 }
 0x300   : > { %v890_v39 = vpop.permute.xlu0 %889  ;;  %v1252_v26 = vsub.f32 2.0, %v1249_v17 }
 0x301   : > { %v896_v51 = vadd.f32 %v890_v39, %v856_v16  ;;  %v1253_v63 = vsub.f32 2.0, %v1250_v29 }
 0x302   : > { %v930_v56 = vpop.permute.xlu1 %929  ;;  %v1255_v31 = vmul.f32 %v2079_v33, %v1252_v26 }
 0x303   : > { %v936_v49 = vadd.f32 %v930_v56, %v896_v51  ;;  %v1256_v22 = vmul.f32 %v2081_v21, %v1253_v63  ;;  %v1358_v51 = vstv %s3048_s21  ;;  %s3121_s21 = sld [smem:[#allocation3 + $0x3e]] }
 0x304   : > { %v928_v24 = vpop.permute.xlu0 %927  ;;  %v1258_v23 = vmul.f32 %v1255_v31, %v1243_v60 }
 0x305   : > { %v935_v58 = vadd.f32 %v928_v24, %v895_v27  ;;  %v1259_v32 = vmul.f32 %v1256_v22, %v1244_v50 }
 0x306   : > { %v968_v48 = vpop.permute.xlu1 %967  ;;  %v1261_v47 = vsub.f32 2.0, %v1258_v23 }
 0x307   : > { %v975_v3 = vadd.f32 %v968_v48, %v935_v58  ;;  %v1262_v36 = vsub.f32 2.0, %v1259_v32  ;;  %v1366_v58 = vstv %s3050_s26  ;;  %s3132_s26 = sld [smem:[#allocation3 + $0x43]] }
 0x308   : > { %v970_v37 = vpop.permute.xlu0 %969  ;;  %v1264_v53 = vmul.f32 %v1261_v47, %v1255_v31 }
 0x309   : > { %v976_v14 = vadd.f32 %v970_v37, %v936_v49  ;;  %v1265_v18 = vmul.f32 %v1262_v36, %v1256_v22 }
 0x30a   : > { %v1010_v9 = vpop.permute.xlu1 %1009 }
 0x30b   : > { %v1016_v41 = vadd.f32 %v1010_v9, %v976_v14 }
 0x30c   : > { %v1008_v15 = vpop.permute.xlu0 %1007 }
 0x30d   : > { %v1015_v57 = vadd.f32 %v1008_v15, %v975_v3  ;;  %v1374_v3 = vstv %s3054_s29  ;;  %s1972_s29 = sld [smem:[#allocation3 + $0x3a]] }
 0x30e   : > { %v1090_v45 = vpop.permute.xlu1 %1089 }
 0x30f   : > { %v1055_v62 = vadd.f32 %v2923_v5, %v1015_v57 }
 0x310   : > { %v1050_v2 = vpop.permute.xlu0 %1049 }
 0x311   : > { %v1056_v6 = vadd.f32 %v1050_v2, %v1016_v41  ;;  %v1382_v41 = vstv %s3057_s4  ;;  %s1973_s4 = sld [smem:[#allocation3 + $0x3f]] }
 0x312   : > { %v1128_v42 = vpop.permute.xlu1 %1127 }
 0x313   : > { %v1096_v25 = vadd.f32 %v1090_v45, %v1056_v6  ;;  %v1410_v45 = vstv %s3052_s28  ;;  %s3142_s28 = sld [smem:[#allocation3 + $0x48]] }
 0x314   : > { %v1088_v13 = vpop.permute.xlu0 %1087 }
 0x315   : > { %v1095_v38 = vadd.f32 %v1088_v13, %v1055_v62  ;;  %v1424_v13 = vstv %s3059_s5  ;;  %s1974_s5 = sld [smem:[#allocation3 + $0x44]] }
 0x316   : > { %v1170_v35 = vpop.permute.xlu1 %1169 }
 0x317   : > { %v1135_v43 = vadd.f32 %v1128_v42, %v1095_v38 }
 0x318   : > { %v1130_v12 = vpop.permute.xlu0 %1129 }
 0x319   : > { %v1136_v54 = vadd.f32 %v1130_v12, %v1096_v25  ;;  %v1466_v12 = vstv %s3063_s7  ;;  %s1978_s7 = sld [smem:[#allocation3 + $0x40]] }
 0x31a   : > { %v1208_v34 = vpop.permute.xlu1 %1207 }
 0x31b   : > { %v1176_v44 = vadd.f32 %v1170_v35, %v1136_v54  ;;  %v1390_v35 = vstv %s3061_s6  ;;  %s1977_s6 = sld [smem:[#allocation3 + $0x3b]] }
 0x31c   : > { %v1168_v7 = vpop.permute.xlu0 %1167 }
 0x31d   : > { %v1175_v28 = vadd.f32 %v1168_v7, %v1135_v43  ;;  %v1536_v7 = vstv %s3078_s9 }
 0x31e   : > { %v1276_v19 = vpop.permute.xlu1 %1275 }
 0x31f   : > { %v1215_v1 = vadd.f32 %v1208_v34, %v1175_v28  ;;  %1284 = vst.msk [vmem:[#allocation2] sm:$0xff] %vm289_vm0, %v1276_v19  ;;  %v1438_v34 = vstv %s3068_s8  ;;  %s1980_s8 = sld [smem:[#allocation3 + $0x4a]] }
 0x320   : > { %v1210_v5 = vpop.permute.xlu0 %1209 }
 0x321   : > { %v3021_v46 = vmul.f32 %v1264_v53, %v1215_v1  ;;  %v1216_v60 = vadd.f32 %v1210_v5, %v1176_v44  ;;  %v1452_v44 = vstv %s3084_s10 }
 0x322   : > { %v1298_v50 = vpop.permute.xlu1 %1297 }
 0x323   : > { %v1270_v8 = vmul.f32 %v3021_v46, %v3021_v46  ;;  %v3026_v52 = vmul.f32 %v1265_v18, %v1216_v60  ;;  %1301 = vst.msk [vmem:[#allocation2] sm:$0x3] %vm1300_vm3, %v1298_v50  ;;  %v1606_v60 = vstv %s3095_s18  ;;  %s1989_s18 = sshll.u32 %s2191_s15, 8 }
 0x325   : > { %v1271_v20 = vmul.f32 %v3026_v52, %v3026_v52  ;;  %1277 = vrot.lane.b32.xlu0 %v1270_v8, %s2203_s23 }
 0x327   : > { %v1305_v40 = vrot.slane %v1271_v20, %v1304_v55 }
 0x329   : > { %1307 = vrot.lane.b32.xlu1 %v1305_v40, %s2203_s23  ;;  %1279 = vrot.lane.b32.xlu0 %v1271_v20, %s2203_s23  ;;  %s3040_s23 = sld [smem:[#allocation3 + $0x33]] }
 0x32a   : > { %v1311_v39 = vld [vmem:[#allocation2] sm:$0xff] }
 0x32d   : > { %1316 = vperm.xlu0 %2072, %v1311_v39  }
 0x32f   : > { %v1396_v9 = vstv %s3040_s23  ;;  %s3108_s23 = sld [smem:[#allocation3 + $0x39]] }
 0x331   : > { %2074 = vset.pattern.permute.xlu0 %v3320_v59 }
 0x397   : > { %v1278_v56 = vpop.permute.xlu0 %1277 }
 0x398   : > { %1285 = vst.msk [vmem:[#allocation2 + $0x8] sm:$0xff] %vm289_vm0, %v1278_v56  ;;  %vm1769_vm0 = vcmask 123904  }
 0x39b   : > { %v1308_v0 = vpop.permute.xlu1 %1307  ;;  %v1280_v10 = vpop.permute.xlu0 %1279 }
 0x39c   : > { %1287 = vst.msk [vmem:[#allocation2 + $0x10] sm:$0xf] %vm1286_vm4, %v1280_v10  ;;  %v1480_v10 = vstv %s3108_s23 }
 0x39d   : > { %1310 = vst.msk [vmem:[#allocation2 + $0x12] sm:$0x3] %vm1300_vm3, %v1308_v0  ;;  %vm1767_vm3 = vcmask 130048  }
 0x39f   : > { %v1312_v24 = vld [vmem:[#allocation2 + $0x8] sm:$0xff] }
 0x3a0   : > { %1321 = vperm.xlu1 %2073, %v1312_v24  }
 0x3a4   : > { %v1313_v11 = vld [vmem:[#allocation2 + $0x10] sm:$0xf] }
 0x3a5   : > { %1326 = vperm.xlu1 %2073, %v1313_v11  }
 0x3a9   : > { %2075 = vset.pattern.permute.xlu1 %v3320_v59 }
 0x3ac   : > { %v1317_v4 = vpop.permute.xlu0 %1316 }
 0x3ad   : > { %1329 = vst.msk [vmem:[#allocation2] sm:$0xff] %vm316_vm1, %v1317_v4 }
 0x3b4   : > { %v1333_v48 = vld [vmem:[#allocation2] sm:$0xff] }
 0x3b5   : > { %1338 = vperm.xlu0 %2074, %v1333_v48  }
 0x41f   : > { %v1322_v33 = vpop.permute.xlu1 %1321 }
 0x420   : > { %1330 = vst.msk [vmem:[#allocation2 + $0x8] sm:$0xff] %vm316_vm1, %v1322_v33 }
 0x424   : > { %v1327_v37 = vpop.permute.xlu1 %1326 }
 0x425   : > { %1332 = vst.msk [vmem:[#allocation2 + $0x10] sm:$0xf] %vm1331_vm5, %v1327_v37  ;;  %v1494_v37 = vstv %s3121_s21 }
 0x427   : > { %v1334_v16 = vld [vmem:[#allocation2 + $0x8] sm:$0xff] }
 0x428   : > { %1343 = vperm.xlu1 %2075, %v1334_v16  }
 0x42c   : > { %v1335_v30 = vld [vmem:[#allocation2 + $0x10] sm:$0xf] }
 0x42d   : > { %1348 = vperm.xlu1 %2075, %v1335_v30  }
 0x434   : > { %v1339_v21 = vpop.permute.xlu0 %1338 }
 0x435   : > { %1351 = vst.msk [vmem:[#allocation2] sm:$0xff] %vm338_vm2, %v1339_v21  ;;  %v1508_v21 = vstv %s3132_s26 }
 0x43c   : > { %v3044_v17 = vld [vmem:[#allocation2] sm:$0xff] }
 0x43d   : > { %v1397_v27 = vmul.f32 %v1396_v9, %v3044_v17  ;;  %v1359_v63 = vmul.f32 %v1358_v51, %v3044_v17  ;;  %v1467_v56 = vmul.f32 %v1466_v12, %v3044_v17 }
 0x43f   : > { %1401 = vrot.lane.b32.xlu0 %v1397_v27, %s2205_s30 }
 0x4a7   : > { %v1344_v15 = vpop.permute.xlu1 %1343 }
 0x4a8   : > { %1352 = vst.msk [vmem:[#allocation2 + $0x8] sm:$0xff] %vm338_vm2, %v1344_v15  ;;  %v1522_v15 = vstv %s3142_s28  ;;  %s3216_s28 = scalar_lea.hbm %s3271_s3, %s1989_s18 }
 0x4ac   : > { %v1349_v29 = vpop.permute.xlu1 %1348 }
 0x4ad   : > { %1354 = vst.msk [vmem:[#allocation2 + $0x10] sm:$0xf] %vm1353_vm6, %v1349_v29 }
 0x4af   : > { %v3070_v26 = vld [vmem:[#allocation2 + $0x1] sm:$0xff] }
 0x4b0   : > { %v3072_v49 = vld [vmem:[#allocation2 + $0x2] sm:$0xff]  ;;  %v1367_v2 = vmul.f32 %v1366_v58, %v3070_v26  ;;  %v1411_v57 = vmul.f32 %v1410_v45, %v3070_v26  ;;  %v1481_v48 = vmul.f32 %v1480_v10, %v3070_v26 }
 0x4b1   : > { %v1357_v14 = vld [vmem:[#allocation2 + $0x8] sm:$0xff]  ;;  %v1375_v6 = vmul.f32 %v1374_v3, %v3072_v49  ;;  %v1425_v25 = vmul.f32 %v1424_v13, %v3072_v49  ;;  %v1495_v16 = vmul.f32 %v1494_v37, %v3072_v49 }
 0x4b2   : > { %v3080_v42 = vld [vmem:[#allocation2 + $0x3] sm:$0xff]  ;;  %v1398_v31 = vmul.f32 %v1396_v9, %v1357_v14  ;;  %v1369_v62 = vadd.f32 %v1367_v2, %v1359_v63  ;;  %1415 = vrot.lane.b32.xlu0 %v1411_v57, %s2205_s30  ;;  %v1468_v32 = vmul.f32 %v1466_v12, %v1357_v14  ;;  %v1538_v19 = vmul.f32 %v1536_v7, %v1357_v14 }
 0x4b3   : > { %v3088_v22 = vld [vmem:[#allocation2 + $0x4] sm:$0xff]  ;;  %v1383_v38 = vmul.f32 %v1382_v41, %v3080_v42  ;;  %v1439_v28 = vmul.f32 %v1438_v34, %v3080_v42  ;;  %v1360_v53 = vmul.f32 %v1358_v51, %v1357_v14  ;;  %v1608_v8 = vmul.f32 %v1606_v60, %v1357_v14 }
 0x4b4   : > { %1403 = vrot.lane.b32.xlu1 %v1398_v31, %s2205_s30  ;;  %v1377_v23 = vadd.f32 %v1375_v6, %v1369_v62  ;;  %v1391_v43 = vmul.f32 %v1390_v35, %v3088_v22  ;;  %v3105_v36 = vld [vmem:[#allocation2 + $0x9] sm:$0xff]  ;;  %v1453_v18 = vmul.f32 %v1452_v44, %v3088_v22  ;;  %v1509_v9 = vmul.f32 %v1508_v21, %v3080_v42 }
 0x4b5   : > { %v3111_v1 = vld [vmem:[#allocation2 + $0xa] sm:$0xff]  ;;  %v1368_v5 = vmul.f32 %v1366_v58, %v3105_v36  ;;  %v1412_v0 = vmul.f32 %v1410_v45, %v3105_v36  ;;  %v1523_v29 = vmul.f32 %v1522_v15, %v3088_v22  ;;  %v1482_v51 = vmul.f32 %v1480_v10, %v3105_v36 }
 0x4b6   : > { %v1385_v54 = vadd.f32 %v1383_v38, %v1377_v23  ;;  %1429 = vrot.lane.b32.xlu0 %v1425_v25, %s2205_s30  ;;  %v3117_v50 = vld [vmem:[#allocation2 + $0xb] sm:$0xff]  ;;  %v1376_v20 = vmul.f32 %v1374_v3, %v3111_v1  ;;  %v1426_v33 = vmul.f32 %v1424_v13, %v3111_v1  ;;  %v1537_v58 = vmul.f32 %v1536_v7, %v3044_v17 }
 0x4b7   : > { %v1370_v55 = vadd.f32 %v1368_v5, %v1360_v53  ;;  %v3125_v40 = vld [vmem:[#allocation2 + $0xc] sm:$0xff]  ;;  %v1384_v59 = vmul.f32 %v1382_v41, %v3117_v50  ;;  %v1440_v30 = vmul.f32 %v1438_v34, %v3117_v50  ;;  %v1496_v45 = vmul.f32 %v1494_v37, %v3111_v1 }
 0x4b8   : > { %1473 = vrot.lane.b32.xlu1 %v1468_v32, %s2206_s27  ;;  %v3101_v47 = vadd.f32 %v1391_v43, %v1385_v54  ;;  %v1392_v11 = vmul.f32 %v1390_v35, %v3125_v40  ;;  %v1454_v27 = vmul.f32 %v1452_v44, %v3125_v40  ;;  %v1550_v3 = vstv %s1972_s29 }
 0x4b9   : > { %v1378_v39 = vadd.f32 %v1376_v20, %v1370_v55  ;;  %v1551_v2 = vmul.f32 %v1550_v3, %v3070_v26  ;;  %v1510_v63 = vmul.f32 %v1508_v21, %v3117_v50  ;;  %v1564_v14 = vstv %s1973_s4  ;;  %s2209_s4 = smov [#allocation6]  }
 0x4ba   : > { %1443 = vrot.lane.b32.xlu0 %v1439_v28, %s2205_s30  ;;  %v1565_v57 = vmul.f32 %v1564_v14, %v3072_v49  ;;  %v1524_v41 = vmul.f32 %v1522_v15, %v3125_v40  ;;  %v1578_v31 = vstv %s1974_s5  ;;  %v1552_v6 = vmul.f32 %v1550_v3, %v3105_v36  ;;  %s2121_s5 = sshll.u32 %s2209_s4, 4  ;;  %s2122_s5 = int_to_ptr.vmem [resolvable:$false] %s2121_s5 }
 0x4bb   : > { %v1386_v24 = vadd.f32 %v1384_v59, %v1378_v39  ;;  %v1579_v13 = vmul.f32 %v1578_v31, %v3080_v42  ;;  %v1566_v38 = vmul.f32 %v1564_v14, %v3111_v1  ;;  %v1607_v23 = vmul.f32 %v1606_v60, %v3044_v17 }
 0x4bc   : > { %1543 = vrot.lane.b32.xlu1 %v1538_v19, %s2207_s19  ;;  %v1580_v12 = vmul.f32 %v1578_v31, %v3117_v50  ;;  %v1620_v25 = vstv %s1977_s6  ;;  %v1634_v43 = vstv %s1978_s7  ;;  %v1662_v19 = vstv %s1980_s8 }
 0x4bd   : > { %v3137_v4 = vadd.f32 %v1392_v11, %v1386_v24  ;;  %v1621_v32 = vmul.f32 %v1620_v25, %v3070_v26  ;;  %v1635_v17 = vmul.f32 %v1634_v43, %v3072_v49  ;;  %v1622_v54 = vmul.f32 %v1620_v25, %v3105_v36 }
 0x4be   : > { %1457 = vrot.lane.b32.xlu0 %v1453_v18, %s2205_s30  ;;  %v1636_v26 = vmul.f32 %v1634_v43, %v3111_v1  ;;  %v1663_v44 = vmul.f32 %v1662_v19, %v3088_v22  ;;  %v1664_v36 = vmul.f32 %v1662_v19, %v3125_v40 }
 0x4c0   : > { %1613 = vrot.lane.b32.xlu1 %v1608_v8, %s2208_s11 }
 0x4c2   : > { %1471 = vrot.lane.b32.xlu0 %v1467_v56, %s2206_s27 }
 0x4c4   : > { %1417 = vrot.lane.b32.xlu1 %v1412_v0, %s2205_s30 }
 0x4c6   : > { %1485 = vrot.lane.b32.xlu0 %v1481_v48, %s2206_s27 }
 0x4c8   : > { %1431 = vrot.lane.b32.xlu1 %v1426_v33, %s2205_s30 }
 0x4ca   : > { %1499 = vrot.lane.b32.xlu0 %v1495_v16, %s2206_s27 }
 0x4cc   : > { %1445 = vrot.lane.b32.xlu1 %v1440_v30, %s2205_s30 }
 0x4ce   : > { %1513 = vrot.lane.b32.xlu0 %v1509_v9, %s2206_s27 }
 0x4d0   : > { %1459 = vrot.lane.b32.xlu1 %v1454_v27, %s2205_s30  ;;  %s1975_s30 = sld [smem:[#allocation3 + $0x49]] }
 0x4d2   : > { %1527 = vrot.lane.b32.xlu0 %v1523_v29, %s2206_s27 }
 0x4d4   : > { %1487 = vrot.lane.b32.xlu1 %v1482_v51, %s2206_s27 }
 0x4d6   : > { %1541 = vrot.lane.b32.xlu0 %v1537_v58, %s2207_s19  ;;  %v1592_v62 = vstv %s1975_s30  ;;  %s2123_s30 = scalar_lea.vmem %s2122_s5, 512 }
 0x4d7   : > { %v1593_v35 = vmul.f32 %v1592_v62, %v3088_v22  ;;  %v1594_v34 = vmul.f32 %v1592_v62, %v3125_v40 }
 0x4d8   : > { %1501 = vrot.lane.b32.xlu1 %v1496_v45, %s2206_s27 }
 0x4da   : > { %1555 = vrot.lane.b32.xlu0 %v1551_v2, %s2207_s19 }
 0x4dc   : > { %1515 = vrot.lane.b32.xlu1 %v1510_v63, %s2206_s27 }
 0x4de   : > { %1569 = vrot.lane.b32.xlu0 %v1565_v57, %s2207_s19 }
 0x4e0   : > { %1529 = vrot.lane.b32.xlu1 %v1524_v41, %s2206_s27  ;;  %s1979_s27 = sld [smem:[#allocation3 + $0x45]] }
 0x4e2   : > { %1583 = vrot.lane.b32.xlu0 %v1579_v13, %s2207_s19 }
 0x4e4   : > { %1557 = vrot.lane.b32.xlu1 %v1552_v6, %s2207_s19 }
 0x4e6   : > { %1597 = vrot.lane.b32.xlu0 %v1593_v35, %s2207_s19  ;;  %v1648_v7 = vstv %s1979_s27 }
 0x4e7   : > { %v1649_v28 = vmul.f32 %v1648_v7, %v3080_v42  ;;  %v1650_v49 = vmul.f32 %v1648_v7, %v3117_v50  ;;  %v1402_v42 = vpop.permute.xlu0 %1401 }
 0x4e8   : > { %1571 = vrot.lane.b32.xlu1 %v1566_v38, %s2207_s19  ;;  %v1407_v30 = vadd.f32 %v1402_v42, %v3101_v47 }
 0x4ea   : > { %1611 = vrot.lane.b32.xlu0 %v1607_v23, %s2208_s11 }
 0x4ec   : > { %1585 = vrot.lane.b32.xlu1 %v1580_v12, %s2207_s19 }
 0x4ee   : > { %1625 = vrot.lane.b32.xlu0 %v1621_v32, %s2208_s11 }
 0x4f0   : > { %1599 = vrot.lane.b32.xlu1 %v1594_v34, %s2207_s19  ;;  %s1981_s19 = sld [smem:[#allocation3 + $0x4c]] }
 0x4f2   : > { %1639 = vrot.lane.b32.xlu0 %v1635_v17, %s2208_s11 }
 0x4f4   : > { %1627 = vrot.lane.b32.xlu1 %v1622_v54, %s2208_s11 }
 0x4f6   : > { %1653 = vrot.lane.b32.xlu0 %v1649_v28, %s2208_s11 }
 0x4f8   : > { %1641 = vrot.lane.b32.xlu1 %v1636_v26, %s2208_s11 }
 0x4fa   : > { %1667 = vrot.lane.b32.xlu0 %v1663_v44, %s2208_s11 }
 0x4fc   : > { %1655 = vrot.lane.b32.xlu1 %v1650_v49, %s2208_s11 }
 0x500   : > { %1669 = vrot.lane.b32.xlu1 %v1664_v36, %s2208_s11  ;;  %s245_s11 = sand.u32 1, %s2183_s13  }
 0x501   : > { %s1903_s9 = sshll.u32 %s245_s11, 4  ;;  %s3222_s15 = scalar_lea.sflag [#allocation4], %s245_s11 }
 0x502   : > { %s247_s10 = scalar_lea.vmem [#allocation6], %s1903_s9 }
 0x503   : > { %s1787_s23 = sshll.u32 %s247_s10, 4  ;;  %s3218_s23 = int_to_ptr.vmem [resolvable:$true] %s1787_s23 }
 0x504   : > { %s2117_s29 = scalar_lea.vmem %s3218_s23, 256  ;;  %p2124_p0 = scmp.lt.s32.totalorder %s3218_s23, %s2122_s5 }
 0x505   : > { %p2118_p10 = scmp.ne.s32.totalorder %s3218_s23, %s2117_s29  ;;  %p2125_p1 = scmp.lt.s32.totalorder %s2123_s30, %s2117_s29 }
 0x507   : > { %p2119_p11 = pnand %p2118_p10, %p2272_p4  ;;  %p2126_p2 = por %p2125_p1, %p2124_p0 }
 0x509   : > { %p2120_p13 = pneg %p2119_p11 }
 0x50b   : > { %p2127_p3 = pnand %p2126_p2, %p2120_p13 }
 0x524   : > { %v1416_v53 = vpop.permute.xlu0 %1415 }
 0x525   : > { %v1421_v27 = vadd.f32 %v1416_v53, %v1407_v30 }
 0x526   : > { %v1404_v1 = vpop.permute.xlu1 %1403 }
 0x527   : > { %v1408_v10 = vadd.f32 %v1404_v1, %v3137_v4 }
 0x528   : > { %v1430_v5 = vpop.permute.xlu0 %1429 }
 0x529   : > { %v1435_v29 = vadd.f32 %v1430_v5, %v1421_v27 }
 0x52a   : > { %v1474_v60 = vpop.permute.xlu1 %1473 }
 0x52c   : > { %v1444_v18 = vpop.permute.xlu0 %1443 }
 0x52d   : > { %v1449_v45 = vadd.f32 %v1444_v18, %v1435_v29 }
 0x52e   : > { %v1544_v8 = vpop.permute.xlu1 %1543 }
 0x530   : > { %v1458_v55 = vpop.permute.xlu0 %1457 }
 0x531   : > { %v1463_v2 = vadd.f32 %v1458_v55, %v1449_v45 }
 0x532   : > { %v1614_v20 = vpop.permute.xlu1 %1613 }
 0x534   : > { %v1472_v22 = vpop.permute.xlu0 %1471 }
 0x535   : > { %v1477_v14 = vadd.f32 %v1472_v22, %v1463_v2 }
 0x536   : > { %v1418_v39 = vpop.permute.xlu1 %1417 }
 0x537   : > { %v1422_v11 = vadd.f32 %v1418_v39, %v1408_v10 }
 0x538   : > { %v1486_v50 = vpop.permute.xlu0 %1485 }
 0x539   : > { %v1491_v31 = vadd.f32 %v1486_v50, %v1477_v14 }
 0x53a   : > { %v1432_v59 = vpop.permute.xlu1 %1431 }
 0x53b   : > { %v1436_v48 = vadd.f32 %v1432_v59, %v1422_v11 }
 0x53c   : > { %v1500_v56 = vpop.permute.xlu0 %1499 }
 0x53d   : > { %v1505_v62 = vadd.f32 %v1500_v56, %v1491_v31 }
 0x53e   : > { %v1446_v0 = vpop.permute.xlu1 %1445 }
 0x53f   : > { %v1450_v16 = vadd.f32 %v1446_v0, %v1436_v48 }
 0x540   : > { %v1514_v40 = vpop.permute.xlu0 %1513 }
 0x541   : > { %v1519_v38 = vadd.f32 %v1514_v40, %v1505_v62 }
 0x542   : > { %v1460_v24 = vpop.permute.xlu1 %1459 }
 0x543   : > { %v1464_v21 = vadd.f32 %v1460_v24, %v1450_v16 }
 0x544   : > { %v1528_v33 = vpop.permute.xlu0 %1527 }
 0x545   : > { %v1478_v51 = vadd.f32 %v1474_v60, %v1464_v21  ;;  %v1533_v12 = vadd.f32 %v1528_v33, %v1519_v38 }
 0x546   : > { %v1488_v37 = vpop.permute.xlu1 %1487 }
 0x547   : > { %v1492_v4 = vadd.f32 %v1488_v37, %v1478_v51 }
 0x548   : > { %v1542_v9 = vpop.permute.xlu0 %1541 }
 0x549   : > { %v1547_v34 = vadd.f32 %v1542_v9, %v1533_v12 }
 0x54a   : > { %v1502_v15 = vpop.permute.xlu1 %1501 }
 0x54b   : > { %v1506_v41 = vadd.f32 %v1502_v15, %v1492_v4 }
 0x54c   : > { %v1556_v58 = vpop.permute.xlu0 %1555 }
 0x54d   : > { %v1561_v17 = vadd.f32 %v1556_v58, %v1547_v34 }
 0x54e   : > { %v1516_v3 = vpop.permute.xlu1 %1515 }
 0x54f   : > { %v1520_v13 = vadd.f32 %v1516_v3, %v1506_v41 }
 0x550   : > { %v1570_v63 = vpop.permute.xlu0 %1569 }
 0x551   : > { %v1575_v28 = vadd.f32 %v1570_v63, %v1561_v17 }
 0x552   : > { %v1530_v57 = vpop.permute.xlu1 %1529 }
 0x553   : > { %v1534_v35 = vadd.f32 %v1530_v57, %v1520_v13 }
 0x554   : > { %v1584_v6 = vpop.permute.xlu0 %1583 }
 0x555   : > { %v1548_v32 = vadd.f32 %v1544_v8, %v1534_v35  ;;  %v1589_v44 = vadd.f32 %v1584_v6, %v1575_v28 }
 0x556   : > { %v1558_v47 = vpop.permute.xlu1 %1557 }
 0x557   : > { %v1562_v7 = vadd.f32 %v1558_v47, %v1548_v32 }
 0x558   : > { %v1598_v23 = vpop.permute.xlu0 %1597 }
 0x559   : > { %v1603_v42 = vadd.f32 %v1598_v23, %v1589_v44 }
 0x55a   : > { %v1572_v25 = vpop.permute.xlu1 %1571 }
 0x55b   : > { %v1576_v26 = vadd.f32 %v1572_v25, %v1562_v7 }
 0x55c   : > { %v1612_v43 = vpop.permute.xlu0 %1611 }
 0x55d   : > { %v1617_v5 = vadd.f32 %v1612_v43, %v1603_v42 }
 0x55e   : > { %v1586_v54 = vpop.permute.xlu1 %1585 }
 0x55f   : > { %v1590_v36 = vadd.f32 %v1586_v54, %v1576_v26 }
 0x560   : > { %v1626_v19 = vpop.permute.xlu0 %1625 }
 0x561   : > { %v1631_v18 = vadd.f32 %v1626_v19, %v1617_v5 }
 0x562   : > { %v1600_v49 = vpop.permute.xlu1 %1599 }
 0x563   : > { %v1604_v53 = vadd.f32 %v1600_v49, %v1590_v36 }
 0x564   : > { %v1640_v1 = vpop.permute.xlu0 %1639 }
 0x565   : > { %v1618_v55 = vadd.f32 %v1614_v20, %v1604_v53  ;;  %v1645_v8 = vadd.f32 %v1640_v1, %v1631_v18  ;;  %v1692_v20 = vstv %s1981_s19 }
 0x566   : > { %v1628_v60 = vpop.permute.xlu1 %1627 }
 0x567   : > { %v1632_v59 = vadd.f32 %v1628_v60, %v1618_v55 }
 0x568   : > { %v1654_v22 = vpop.permute.xlu0 %1653 }
 0x569   : > { %v1659_v50 = vadd.f32 %v1654_v22, %v1645_v8 }
 0x56a   : > { %v1642_v39 = vpop.permute.xlu1 %1641 }
 0x56b   : > { %v1646_v40 = vadd.f32 %v1642_v39, %v1632_v59 }
 0x56c   : > { %v1668_v56 = vpop.permute.xlu0 %1667 }
 0x56d   : > { %v1673_v10 = vadd.f32 %v1668_v56, %v1659_v50 }
 0x56e   : > { %v1656_v0 = vpop.permute.xlu1 %1655 }
 0x56f   : > { %v1675_v24 = vadd.f32 1e-06, %v1673_v10  ;;  %v1660_v11 = vadd.f32 %v1656_v0, %v1646_v40 }
 0x571   : > { %2082 = vrsqrt.f32 %v1675_v24  ;;  %vm1679_vm7 = vcmp.eq.f32.partialorder %v1675_v24, inf  ;;  %v1682_v21 = vand.u32 2147483648, %v1675_v24  ;;  %vm1681_vm8 = vcmp.eq.f32.partialorder %v1675_v24, 0.0 }
 0x572   : > { %v1670_v48 = vpop.permute.xlu1 %1669 }
 0x573   : > { %v1674_v33 = vadd.f32 %v1670_v48, %v1660_v11 }
 0x575   : > { %v1676_v37 = vadd.f32 1e-06, %v1674_v33 }
 0x577   : > { %2084 = vrsqrt.f32 %v1676_v37  ;;  %vm1686_vm9 = vcmp.eq.f32.partialorder %v1676_v37, inf  ;;  %v1689_v45 = vand.u32 2147483648, %v1676_v37  ;;  %vm1688_vm10 = vcmp.eq.f32.partialorder %v1676_v37, 0.0 }
 0x57b   : > { %v2083_v16 = vpop.eup %2082 }
 0x57c   : > { %v1678_v30 = vmul.f32 %v2083_v16, %v1675_v24 }
 0x57e   : > { %v1680_v9 = vsel %vm1679_vm7, %v1675_v24, %v1678_v30 }
 0x57f   : > { %v1683_v27 = vsel %vm1681_vm8, %v1682_v21, %v1680_v9 }
 0x580   : > { %v1693_v29 = vmul.f32 %v1692_v20, %v1683_v27 }
 0x581   : > { %v2085_v15 = vpop.eup %2084 }
 0x582   : > { %v1685_v51 = vmul.f32 %v2085_v15, %v1676_v37  ;;  %v1695_v58 = vadd.f32 1.0, %v1693_v29 }
 0x584   : > { %v1687_v3 = vsel %vm1686_vm9, %v1676_v37, %v1685_v51  ;;  %2086 = vrcp.f32 %v1695_v58 }
 0x585   : > { %v1690_v2 = vsel %vm1688_vm10, %v1689_v45, %v1687_v3 }
 0x586   : > { %v1694_v4 = vmul.f32 %v1692_v20, %v1690_v2 }
 0x588   : > { %v1696_v63 = vadd.f32 1.0, %v1694_v4 }
 0x58a   : > { %2088 = vrcp.f32 %v1696_v63 }
 0x58e   : > { %v2087_v14 = vpop.eup %2086 }
 0x58f   : > { %v1699_v57 = vmul.f32 %v2087_v14, %v1695_v58 }
 0x591   : > { %v1701_v41 = vsub.f32 2.0, %v1699_v57 }
 0x593   : > { %v1703_v13 = vmul.f32 %v2087_v14, %v1701_v41 }
 0x594   : > { %v2089_v31 = vpop.eup %2088 }
 0x595   : > { %v1700_v6 = vmul.f32 %v2089_v31, %v1696_v63  ;;  %v1705_v62 = vmul.f32 %v1703_v13, %v1695_v58 }
 0x597   : > { %v1702_v47 = vsub.f32 2.0, %v1700_v6  ;;  %v1707_v35 = vsub.f32 2.0, %v1705_v62 }
 0x599   : > { %v1704_v38 = vmul.f32 %v2089_v31, %v1702_v47  ;;  %v1709_v23 = vmul.f32 %v1707_v35, %v1703_v13 }
 0x59b   : > { %v1706_v12 = vmul.f32 %v1704_v38, %v1696_v63  ;;  %v1714_v25 = vrot.slane %v1709_v23, 6 }
 0x59d   : > { %v1708_v32 = vsub.f32 2.0, %v1706_v12  ;;  %v1720_v34 = vmul.f32 %v1714_v25, %v2984_v61 }
 0x59f   : > { %v1710_v43 = vmul.f32 %v1708_v32, %v1704_v38  ;;  %v1726_v17 = vmin.f32 %v1720_v34, 20.0  ;;  %vm1723_vm14 = vcmp.gt.f32.partialorder %v1720_v34, 20.0 }
 0x5a1   : > { %v1715_v54 = vrot.slane %v1710_v43, 6  ;;  %v1729_v7 = vmul.f32 1.442695, %v1726_v17 }
 0x5a3   : > { %v1716_v28 = vsel %vm1713_vm11, %v1714_v25, %v1715_v54  ;;  %v1722_v26 = vmul.f32 %v1715_v54, %v3026_v52  ;;  %2090 = vpow2.f32 %v1729_v7 }
 0x5a4   : > { %v1721_v19 = vmul.f32 %v1716_v28, %v3021_v46 }
 0x5a5   : > { %v1728_v44 = vmin.f32 %v1722_v26, 20.0  ;;  %vm1725_vm1 = vcmp.gt.f32.partialorder %v1722_v26, 20.0 }
 0x5a6   : > { %v1727_v49 = vmin.f32 %v1721_v19, 20.0  ;;  %vm1724_vm4 = vcmp.gt.f32.partialorder %v1721_v19, 20.0 }
 0x5a7   : > { %v1733_v36 = vmul.f32 1.442695, %v1728_v44 }
 0x5a8   : > { %v1731_v42 = vmul.f32 1.442695, %v1727_v49 }
 0x5a9   : > { %2092 = vpow2.f32 %v1733_v36 }
 0x5aa   : > { %2094 = vpow2.f32 %v1731_v42 }
 0x5ad   : > { %v2091_v61 = vpop.eup %2090 }
 0x5ae   : > { %v1735_v53 = vadd.f32 1.0, %v2091_v61  ;;  %v1738_v60 = vmul.f32 -0.5, %v2091_v61  ;;  %v1741_v52 = vand.u32 2147483647, %v2091_v61 }
 0x5b0   : > { %2096 = vlog2.f32 %v1735_v53  ;;  %v1739_v46 = vadd.f32 1.0, %v1738_v60  ;;  %vm1742_vm12 = vcmp.lt.f32.partialorder %v1741_v52, 0.0004427343 }
 0x5b2   : > { %v1740_v59 = vmul.f32 %v2091_v61, %v1739_v46 }
 0x5b3   : > { %v2093_v1 = vpop.eup %2092 }
 0x5b4   : > { %v2095_v5 = vpop.eup %2094  ;;  %v1753_v18 = vadd.f32 1.0, %v2093_v1  ;;  %v1756_v22 = vmul.f32 -0.5, %v2093_v1  ;;  %v1759_v40 = vand.u32 2147483647, %v2093_v1 }
 0x5b5   : > { %v1744_v55 = vadd.f32 1.0, %v2095_v5  ;;  %v1747_v8 = vmul.f32 -0.5, %v2095_v5  ;;  %v1750_v24 = vand.u32 2147483647, %v2095_v5 }
 0x5b6   : > { %2098 = vlog2.f32 %v1753_v18  ;;  %v1757_v56 = vadd.f32 1.0, %v1756_v22  ;;  %vm1760_vm15 = vcmp.lt.f32.partialorder %v1759_v40, 0.0004427343 }
 0x5b7   : > { %2100 = vlog2.f32 %v1744_v55  ;;  %v1748_v10 = vadd.f32 1.0, %v1747_v8  ;;  %vm1751_vm2 = vcmp.lt.f32.partialorder %v1750_v24, 0.0004427343 }
 0x5b8   : > { %v1758_v16 = vmul.f32 %v2093_v1, %v1757_v56 }
 0x5b9   : > { %v1749_v20 = vmul.f32 %v2095_v5, %v1748_v10 }
 0x5ba   : > { %v2097_v39 = vpop.eup %2096 }
 0x5bb   : > { %v1737_v50 = vmul.f32 0.6931472, %v2097_v39 }
 0x5bd   : > { %v1743_v0 = vsel %vm1742_vm12, %v1740_v59, %v1737_v50 }
 0x5be   : > { %v1762_v11 = vsel %vm1723_vm14, %v1720_v34, %v1743_v0 }
 0x5bf   : > { %1766 = vst.msk [vmem:[%s247_s10 - $0x2] sm:$0xfc] %vm1765_vm13, %v1762_v11 }
 0x5c0   : > { %v2099_v48 = vpop.eup %2098 }
 0x5c1   : > { %v2101_v33 = vpop.eup %2100  ;;  %v1755_v37 = vmul.f32 0.6931472, %v2099_v48 }
 0x5c2   : > { %v1746_v30 = vmul.f32 0.6931472, %v2101_v33 }
 0x5c3   : > { %v1761_v21 = vsel %vm1760_vm15, %v1758_v16, %v1755_v37 }
 0x5c4   : > { %v1752_v9 = vsel %vm1751_vm2, %v1749_v20, %v1746_v30  ;;  %v1764_v27 = vsel %vm1725_vm1, %v1722_v26, %v1761_v21 }
 0x5c5   : > { %v1763_v15 = vsel %vm1724_vm4, %v1721_v19, %v1752_v9  ;;  %1770 = vst.msk [vmem:[%s247_s10 + $0xe] sm:$0x3] %vm1769_vm0, %v1764_v27 }
 0x5c6   : > { %1768 = vst.msk [vmem:[%s247_s10 + $0x6] sm:$0xff] %vm1767_vm3, %v1763_v15 }
 0x5c7   : > { %2130 = shalt.err (!%p2127_p3)
}
 0x5c8   : > { %s2131_s6 = scalar_lea.hbm %s3216_s28, 256  ;;  %s2135_s8 = scalar_lea.hbm %s3271_s3, 512 }
 0x5c9   : > { %p2132_p5 = scmp.ne.s32.totalorder %s3216_s28, %s2131_s6  ;;  %p2136_p9 = scmp.lt.u32.totalorder %s3216_s28, %s3271_s3 }
 0x5ca   : > { %p2137_p12 = scmp.lt.u32.totalorder %s2135_s8, %s2131_s6  ;;  %p2139_p11 = scmp.lt.u32.totalorder %s2131_s6, %s3216_s28 }
 0x5cb   : > { %p2133_p6 = pnand %p2132_p5, %p2272_p4 }
 0x5cc   : > { %p2138_p10 = por %p2137_p12, %p2136_p9 }
 0x5cd   : > { %p2134_p7 = pneg %p2133_p6 }
 0x5ce   : > { %p2140_p13 = por %p2139_p11, %p2138_p10 }
 0x5d0   : > { %p2141_p0 = pnand %p2140_p13, %p2134_p7 }
 0x5d2   : > { %2144 = shalt.err (!%p2141_p0)
}
 0x5d3   : > { %s2210_s9 = smov 128   ;;  %s2211_s10 = smov 8  }
 0x5d4   : > { %1996 = dma.vmem_to_hbm [thread:$0]  (%p2272_p4), %s3218_s23, 256, %s3216_s28, %s3222_s15, %s2210_s9, %s2210_s9, %s2211_s10  }
 0x5d5 PF: > { %p2009_p1 = scmp.ge.s32.totalorder %s2199_s17, 2  ;;  %s1802_s18 = sand.u32 1, %s2179_s12  }
 0x5d6   : > { %s1803_s21 = scalar_lea.sflag [#allocation4], %s1802_s18 }
 0x5d7   : > { %p2003_p2 = pnand %p2009_p1, %p2279_p8 }
 0x5d9   : > { %2174 = dma.done.wait (!%p2003_p2), %s1803_s21, 256  }
 0x5da   : > { %2176 = vsyncadd (!%p2003_p2), %s1803_s21, 4294967040  ;;  %s17_s17 = sadd.s32 1, %s2199_s17   ;;  %s3321_s12 = smov %s2183_s13 }
 0x5db   : > { %p14_p3 = scmp.ge.s32.totalorder %s17_s17, 4   ;;  %s3322_s13 = smov %s2187_s14 }
 0x5dc   : > { %s3323_s14 = smov %s2285_s25  ;;  %s3324_s15 = smov %s2195_s16 }
 0x5dd   : > { %s3325_s16 = smov %s3327_s20  ;;  %16 = sbr.rel (!%p14_p3) target bundleno = 5 (0x5), region = 79 }
 0x5e4   :  { %1808 = vsyncpa [#allocation4], 1 }
 0x5e5   :  { %1810 = vsyncpa [#allocation4 + $0x1], 1 }
 0x5e6   :  { %1811 = vsyncpa [#allocation5], 1 }
 0x5e7   :  { %1813 = vsyncpa [#allocation5 + $0x1], 1 }

</bundles_post_ra>
